<compile_context>
chip_gen: v6e
topology: v6e:2x2x1
jax: 0.10.0
libtpu: 0.0.40
codegen_flags: <defaults>
</compile_context>

<pallas_src>
import jax
import jax.numpy as jnp
from jax import lax
from jax.experimental import pallas as pl
from jax.experimental.pallas import tpu as pltpu

# ----------------------- config (small synthetic shapes) -----------------------
DICT_SIZE = 32       # vocabulary V
EMB_SIZE = 16        # E
ENC_HIDDEN = 16      # encoder per-direction hidden
HD = 2 * ENC_HIDDEN  # decoder / attention hidden size
BATCH = 4            # B
MAX_SENTEN_LEN = 6   # L
CONTEXT_SIZE = 3     # C
REPLY_LEN = 3        # T

VMEM = pltpu.MemorySpace.VMEM


def _specs(n):
    return [pl.BlockSpec(memory_space=VMEM) for _ in range(n)]


# ------------------------------ fused Pallas kernel -----------------------------
def seq2seq_kernel(x_ref,                                   # (L, C*B, 2E)  fwd||bwd features
                   ewih_ref, ewhh_ref, ebih_ref, ebhh_ref,  # fused bidir GRU weights
                   pad_ref,                                 # (C*B, 1) 1.0 == padded
                   tW_ref, tU_ref, tvv_ref,                 # topic attention
                   dW_ref, dU_ref, dvv_ref,                 # dynamic attention
                   demb_ref,                                # (T, B, E) teacher-forcing inputs
                   dwih_ref, dwhh_ref, dbih_ref, dbhh_ref,  # decoder GRU
                   wout_ref, bout_ref,                      # output projection
                   logp_ref, hout_ref):                     # (T, B, V), (B, HD)
    L, N, _ = x_ref.shape
    T, B, _ = demb_ref.shape
    C = N // B
    H = hout_ref.shape[1]            # = 2 * enc_hidden = decoder hidden

    # ---------------- encoder: fused bidirectional GRU ----------------
    e_wih = ewih_ref[...]
    e_whh = ewhh_ref[...]
    e_bih = ebih_ref[...]
    e_bhh = ebhh_ref[...]

    def enc_step(t, h):
        xt = x_ref[t]                                         # (N, 2E)
        gi = jnp.dot(xt, e_wih, preferred_element_type=jnp.float32) + e_bih
        gh = jnp.dot(h, e_whh, preferred_element_type=jnp.float32) + e_bhh
        r = jax.nn.sigmoid(gi[:, :H] + gh[:, :H])
        z = jax.nn.sigmoid(gi[:, H:2 * H] + gh[:, H:2 * H])
        n = jnp.tanh(gi[:, 2 * H:] + r * gh[:, 2 * H:])
        return (1.0 - z) * n + z * h

    ch = lax.fori_loop(0, L, enc_step, jnp.zeros((N, H), jnp.float32),
                       unroll=True)                           # (C*B, HD) = [h_f || h_b]
    last_h = ch[(C - 1) * B:, :]                              # (B, HD)

    pad_mask = pad_ref[...] > 0.5                             # (C*B, 1)

    # attention helper: additive attention over contexts, flattened layout
    def attend(h_query, W, chU, v):
        ah = jnp.dot(h_query, W, preferred_element_type=jnp.float32)      # (B, HD)
        t_act = jnp.tanh(jnp.tile(ah, (C, 1)) + chU)                      # (C*B, HD)
        s = jnp.dot(t_act, v, preferred_element_type=jnp.float32)         # (C*B, 1)
        s = jnp.where(pad_mask, -100000.0, s)
        m = s[0:B]
        for c in range(1, C):
            m = jnp.maximum(m, s[c * B:(c + 1) * B])
        e = jnp.exp(s - jnp.tile(m, (C, 1)))
        den = e[0:B]
        for c in range(1, C):
            den = den + e[c * B:(c + 1) * B]
        w = e / jnp.tile(den, (C, 1))                                      # (C*B, 1)
        weighted = w * ch                                                  # (C*B, HD)
        applied = weighted[0:B]
        for c in range(1, C):
            applied = applied + weighted[c * B:(c + 1) * B]
        return applied                                                     # (B, HD)

    # ---------------- topic attention -> topic vector ----------------
    chU_topic = jnp.dot(ch, tU_ref[...], preferred_element_type=jnp.float32)
    topic_vec = attend(last_h, tW_ref[...], chU_topic, tvv_ref[...])       # (B, HD)

    # ---------------- decoder loop (teacher forcing) ----------------
    # hoisted, decode-invariant quantities
    chU_dyna = jnp.dot(ch, dU_ref[...], preferred_element_type=jnp.float32)
    dW = dW_ref[...]
    dv = dvv_ref[...]
    d_wih = dwih_ref[...]
    d_whh = dwhh_ref[...]
    d_bih = dbih_ref[...]
    d_bhh = dbhh_ref[...]
    w_out = wout_ref[...]
    b_out = bout_ref[...]

    dec_h = last_h
    for t in range(T):                                        # T is static & tiny
        applied = attend(dec_h, dW, chU_dyna, dv)             # (B, HD)
        xin = jnp.concatenate([demb_ref[t], topic_vec, applied], axis=1)   # (B, E+2*HD)
        gi = jnp.dot(xin, d_wih, preferred_element_type=jnp.float32) + d_bih
        gh = jnp.dot(dec_h, d_whh, preferred_element_type=jnp.float32) + d_bhh
        r = jax.nn.sigmoid(gi[:, :H] + gh[:, :H])
        z = jax.nn.sigmoid(gi[:, H:2 * H] + gh[:, H:2 * H])
        n = jnp.tanh(gi[:, 2 * H:] + r * gh[:, 2 * H:])
        dec_h = (1.0 - z) * n + z * dec_h

        logits = jnp.dot(dec_h, w_out, preferred_element_type=jnp.float32) + b_out
        mx = jnp.max(logits, axis=1, keepdims=True)
        sh = logits - mx
        logp_ref[t] = sh - jnp.log(jnp.sum(jnp.exp(sh), axis=1, keepdims=True))

    hout_ref[...] = dec_h


# ------------------------------ Seq2Seq.forward ---------------------------------
@jax.jit
def seq2seq_forward(params, contexts_tokens, reply_tokens, pad_matrix, ini_idx):
    emb = params['embedding']
    C, B, L = contexts_tokens.shape
    E = emb.shape[1]
    Henc = params['enc_whh_f'].shape[0]
    T = reply_tokens.shape[0]
    V = params['out_W'].shape[1]

    # encoder input: time-major, forward features || backward (time-reversed) features
    ctx_emb = emb[contexts_tokens]                                   # (C, B, L, E)
    x = jnp.transpose(ctx_emb, (2, 0, 1, 3)).reshape(L, C * B, E)    # (L, C*B, E)
    x_cat = jnp.concatenate([x, x[::-1]], axis=-1)                   # (L, C*B, 2E)

    # build gate-interleaved block-diagonal bidirectional GRU weights (free XLA work)
    def comb_w(wf, wb):
        zf = jnp.zeros_like(wf[:, :Henc])
        zb = jnp.zeros_like(wb[:, :Henc])
        top = jnp.concatenate([wf[:, :Henc], zf,
                               wf[:, Henc:2 * Henc], zf,
                               wf[:, 2 * Henc:], zf], axis=1)
        bot = jnp.concatenate([zb, wb[:, :Henc],
                               zb, wb[:, Henc:2 * Henc],
                               zb, wb[:, 2 * Henc:]], axis=1)
        return jnp.concatenate([top, bot], axis=0)

    def comb_b(bf, bb):
        return jnp.concatenate([bf[:, :Henc], bb[:, :Henc],
                                bf[:, Henc:2 * Henc], bb[:, Henc:2 * Henc],
                                bf[:, 2 * Henc:], bb[:, 2 * Henc:]], axis=1)

    e_wih = comb_w(params['enc_wih_f'], params['enc_wih_b'])         # (2E, 6*Henc)
    e_whh = comb_w(params['enc_whh_f'], params['enc_whh_b'])         # (2*Henc, 6*Henc)
    e_bih = comb_b(params['enc_bih_f'], params['enc_bih_b'])
    e_bhh = comb_b(params['enc_bhh_f'], params['enc_bhh_b'])

    # pad mask flattened to match ch row ordering (row = c*B + b)
    pad_flat = pad_matrix.T.reshape(C * B, 1).astype(jnp.float32)

    # teacher-forcing decoder inputs: [ini, reply[0..T-2]] pre-gathered embeddings
    dec_in_tokens = jnp.concatenate(
        [jnp.full((1, B), ini_idx, reply_tokens.dtype), reply_tokens[:-1]], axis=0)
    dec_emb = emb[dec_in_tokens]                                     # (T, B, E)

    logp, dec_h = pl.pallas_call(
        seq2seq_kernel,
        out_shape=(jax.ShapeDtypeStruct((T, B, V), jnp.float32),
                   jax.ShapeDtypeStruct((B, 2 * Henc), jnp.float32)),
        in_specs=_specs(19),
        out_specs=(pl.BlockSpec(memory_space=VMEM),
                   pl.BlockSpec(memory_space=VMEM)),
    )(x_cat, e_wih, e_whh, e_bih, e_bhh,
      pad_flat,
      params['topic_W'], params['topic_U'], params['topic_v'],
      params['dyna_W'], params['dyna_U'], params['dyna_v'],
      dec_emb, params['dec_wih'], params['dec_whh'], params['dec_bih'], params['dec_bhh'],
      params['out_W'], params['out_b'])
    return logp, dec_h


# ------------------------ pure-JAX reference (for checking) ---------------------
def _mm(a, b):
    return jnp.dot(a, b, precision=lax.Precision.HIGHEST)


def _ref_gru_cell(x, h, wih, whh, bih, bhh):
    H = whh.shape[0]
    gi = _mm(x, wih) + bih
    gh = _mm(h, whh) + bhh
    r = jax.nn.sigmoid(gi[:, :H] + gh[:, :H])
    z = jax.nn.sigmoid(gi[:, H:2 * H] + gh[:, H:2 * H])
    n = jnp.tanh(gi[:, 2 * H:] + r * gh[:, 2 * H:])
    return (1.0 - z) * n + z * h


def reference_forward(p, contexts_tokens, reply_tokens, pad_matrix, ini_idx):
    emb = p['embedding']
    C, B, L = contexts_tokens.shape
    Henc = p['enc_whh_f'].shape[0]
    list_ch = []
    for c in range(C):
        xc = emb[contexts_tokens[c]]
        hf = jnp.zeros((B, Henc), jnp.float32)
        hb = jnp.zeros((B, Henc), jnp.float32)
        for t in range(L):
            hf = _ref_gru_cell(xc[:, t, :], hf, p['enc_wih_f'], p['enc_whh_f'],
                               p['enc_bih_f'], p['enc_bhh_f'])
        for t in range(L - 1, -1, -1):
            hb = _ref_gru_cell(xc[:, t, :], hb, p['enc_wih_b'], p['enc_whh_b'],
                               p['enc_bih_b'], p['enc_bhh_b'])
        list_ch.append(jnp.concatenate([hf, hb], axis=1))
    ch = jnp.stack(list_ch, 0)
    last = list_ch[-1]

    ah = _mm(last, p['topic_W'])
    scores = jnp.concatenate(
        [_mm(jnp.tanh(ah + _mm(list_ch[c], p['topic_U'])), p['topic_v']) for c in range(C)], 1)
    scores = jnp.where(pad_matrix, -100000.0, scores)
    w = jax.nn.softmax(scores, axis=1)
    context_hiddens = jnp.transpose(ch, (1, 0, 2))
    tv = jnp.einsum('bc,bch->bh', w, context_hiddens)

    dec_h = last
    dec_in = jnp.full((B,), ini_idx, jnp.int32)
    outs = []
    for t in range(reply_tokens.shape[0]):
        x_e = emb[dec_in]
        ah_d = _mm(dec_h, p['dyna_W'])
        sc = jnp.concatenate(
            [_mm(jnp.tanh(ah_d + _mm(list_ch[c], p['dyna_U'])), p['dyna_v']) for c in range(C)], 1)
        sc = jnp.where(pad_matrix, -100000.0, sc)
        wd = jax.nn.softmax(sc, axis=1)
        applied = jnp.einsum('bc,bch->bh', wd, context_hiddens)
        xin = jnp.concatenate([x_e, tv, applied], axis=1)
        dec_h = _ref_gru_cell(xin, dec_h, p['dec_wih'], p['dec_whh'], p['dec_bih'], p['dec_bhh'])
        logits = _mm(dec_h, p['out_W']) + p['out_b']
        outs.append(jax.nn.log_softmax(logits, axis=1))
        dec_in = reply_tokens[t]
    return jnp.stack(outs, 0), dec_h


# --------------------------------- parameters -----------------------------------
def init_params(key):
    ks = jax.random.split(key, 16)

    def xavier(k, shape):
        a = (6.0 / (shape[0] + shape[1])) ** 0.5
        return jax.random.uniform(k, shape, jnp.float32, -a, a)

    H3e, H3d = 3 * ENC_HIDDEN, 3 * HD
    p = {}
    p['embedding'] = 0.1 * jax.random.normal(ks[0], (DICT_SIZE, EMB_SIZE), jnp.float32)
    # Encoder: bidirectional GRU(E -> ENC_HIDDEN)
    p['enc_wih_f'] = xavier(ks[1], (EMB_SIZE, H3e))
    p['enc_whh_f'] = xavier(ks[2], (ENC_HIDDEN, H3e))
    p['enc_bih_f'] = jnp.zeros((1, H3e), jnp.float32)
    p['enc_bhh_f'] = jnp.zeros((1, H3e), jnp.float32)
    p['enc_wih_b'] = xavier(ks[3], (EMB_SIZE, H3e))
    p['enc_whh_b'] = xavier(ks[4], (ENC_HIDDEN, H3e))
    p['enc_bih_b'] = jnp.zeros((1, H3e), jnp.float32)
    p['enc_bhh_b'] = jnp.zeros((1, H3e), jnp.float32)
    # Topic / dynamic attention
    p['topic_W'] = xavier(ks[5], (HD, HD))
    p['topic_U'] = xavier(ks[6], (HD, HD))
    p['topic_v'] = xavier(ks[7], (HD, 1))
    p['dyna_W'] = xavier(ks[8], (HD, HD))
    p['dyna_U'] = xavier(ks[9], (HD, HD))
    p['dyna_v'] = xavier(ks[10], (HD, 1))
    # Decoder GRU(E + 2*HD -> HD) and output Linear(HD -> V)
    p['dec_wih'] = xavier(ks[11], (EMB_SIZE + 2 * HD, H3d))
    p['dec_whh'] = xavier(ks[12], (HD, H3d))
    p['dec_bih'] = jnp.zeros((1, H3d), jnp.float32)
    p['dec_bhh'] = jnp.zeros((1, H3d), jnp.float32)
    p['out_W'] = xavier(ks[13], (HD, DICT_SIZE))
    p['out_b'] = jnp.zeros((1, DICT_SIZE), jnp.float32)
    return p


# ------------------------------------ main ---------------------------------------
if __name__ == "__main__":
    key = jax.random.PRNGKey(0)
    kp, kc, kr, km = jax.random.split(key, 4)
    params = init_params(kp)

    contexts = jax.random.randint(kc, (CONTEXT_SIZE, BATCH, MAX_SENTEN_LEN),
                                  0, DICT_SIZE, jnp.int32)
    replies = jax.random.randint(kr, (REPLY_LEN, BATCH), 0, DICT_SIZE, jnp.int32)
    pad = jax.random.uniform(km, (BATCH, CONTEXT_SIZE)) < 0.3   # True == padded context
    ini_idx = 1

    logp, dec_h = seq2seq_forward(params, contexts, replies, pad, ini_idx)
    jax.block_until_ready((logp, dec_h))

    ref_logp, ref_h = reference_forward(params, contexts, replies, pad, ini_idx)
    assert logp.shape == (REPLY_LEN, BATCH, DICT_SIZE)
    assert jnp.allclose(logp, ref_logp, atol=2e-3, rtol=2e-3), \
        float(jnp.max(jnp.abs(logp - ref_logp)))
    assert jnp.allclose(dec_h, ref_h, atol=2e-3, rtol=2e-3)

    print("KERNEL_OK")
</pallas_src>

<mosaic_0001>
module attributes {stable_mosaic.version = 11 : i64} {
  func.func @seq2seq_kernel(%arg0: memref<6x12x32xf32, #tpu.memory_space<vmem>>, %arg1: memref<32x96xf32, #tpu.memory_space<vmem>>, %arg2: memref<32x96xf32, #tpu.memory_space<vmem>>, %arg3: memref<1x96xf32, #tpu.memory_space<vmem>>, %arg4: memref<1x96xf32, #tpu.memory_space<vmem>>, %arg5: memref<12x1xf32, #tpu.memory_space<vmem>>, %arg6: memref<32x32xf32, #tpu.memory_space<vmem>>, %arg7: memref<32x32xf32, #tpu.memory_space<vmem>>, %arg8: memref<32x1xf32, #tpu.memory_space<vmem>>, %arg9: memref<32x32xf32, #tpu.memory_space<vmem>>, %arg10: memref<32x32xf32, #tpu.memory_space<vmem>>, %arg11: memref<32x1xf32, #tpu.memory_space<vmem>>, %arg12: memref<3x4x16xf32, #tpu.memory_space<vmem>>, %arg13: memref<80x96xf32, #tpu.memory_space<vmem>>, %arg14: memref<32x96xf32, #tpu.memory_space<vmem>>, %arg15: memref<1x96xf32, #tpu.memory_space<vmem>>, %arg16: memref<1x96xf32, #tpu.memory_space<vmem>>, %arg17: memref<32x32xf32, #tpu.memory_space<vmem>>, %arg18: memref<1x32xf32, #tpu.memory_space<vmem>>, %arg19: memref<3x4x32xf32, #tpu.memory_space<vmem>>, %arg20: memref<4x32xf32, #tpu.memory_space<vmem>>) attributes {dimension_semantics = [], scalar_prefetch = 0 : i64, scratch_operands = 0 : i64, tpu.core_type = #tpu.core_type<tc>} {
    %c0 = arith.constant 0 : index
    %c0_0 = arith.constant 0 : index
    %0 = vector.load %arg1[%c0, %c0_0] : memref<32x96xf32, #tpu.memory_space<vmem>>, vector<32x96xf32>
    %c0_1 = arith.constant 0 : index
    %c0_2 = arith.constant 0 : index
    %1 = vector.load %arg2[%c0_1, %c0_2] : memref<32x96xf32, #tpu.memory_space<vmem>>, vector<32x96xf32>
    %c0_3 = arith.constant 0 : index
    %c0_4 = arith.constant 0 : index
    %2 = vector.load %arg3[%c0_3, %c0_4] : memref<1x96xf32, #tpu.memory_space<vmem>>, vector<1x96xf32>
    %c0_5 = arith.constant 0 : index
    %c0_6 = arith.constant 0 : index
    %3 = vector.load %arg4[%c0_5, %c0_6] : memref<1x96xf32, #tpu.memory_space<vmem>>, vector<1x96xf32>
    %cst = arith.constant 0.000000e+00 : f32
    %4 = vector.broadcast %cst : f32 to vector<12x32xf32>
    %c0_i32 = arith.constant 0 : i32
    %5 = arith.index_cast %c0_i32 : i32 to index
    %c0_7 = arith.constant 0 : index
    %c0_8 = arith.constant 0 : index
    %6 = vector.load %arg0[%5, %c0_7, %c0_8] : memref<6x12x32xf32, #tpu.memory_space<vmem>>, vector<1x12x32xf32>
    %7 = vector.shape_cast %6 : vector<1x12x32xf32> to vector<12x32xf32>
    %cst_9 = arith.constant dense<0.000000e+00> : vector<12x96xf32>
    %8 = tpu.matmul %7, %0, %cst_9 {dimension_numbers = #tpu.dot_dimension_numbers<[1], [0], [0], [1], [0, 0, 1, 1], [], []>} : vector<12x32xf32>, vector<32x96xf32>, vector<12x96xf32> -> vector<12x96xf32>
    %9 = vector.broadcast %2 : vector<1x96xf32> to vector<12x96xf32>
    %10 = arith.addf %8, %9 : vector<12x96xf32>
    %cst_10 = arith.constant dense<0.000000e+00> : vector<12x96xf32>
    %11 = tpu.matmul %4, %1, %cst_10 {dimension_numbers = #tpu.dot_dimension_numbers<[1], [0], [0], [1], [0, 0, 1, 1], [], []>} : vector<12x32xf32>, vector<32x96xf32>, vector<12x96xf32> -> vector<12x96xf32>
    %12 = vector.broadcast %3 : vector<1x96xf32> to vector<12x96xf32>
    %13 = arith.addf %11, %12 : vector<12x96xf32>
    %14 = vector.extract_strided_slice %10 {offsets = [0, 0], sizes = [12, 32], strides = [1, 1]} : vector<12x96xf32> to vector<12x32xf32>
    %15 = vector.extract_strided_slice %13 {offsets = [0, 0], sizes = [12, 32], strides = [1, 1]} : vector<12x96xf32> to vector<12x32xf32>
    %16 = arith.addf %14, %15 : vector<12x32xf32>
    %17 = arith.negf %16 : vector<12x32xf32>
    %18 = math.exp %17 : vector<12x32xf32>
    %cst_11 = arith.constant 1.000000e+00 : f32
    %19 = vector.broadcast %cst_11 : f32 to vector<12x32xf32>
    %20 = arith.addf %19, %18 : vector<12x32xf32>
    %21 = arith.divf %19, %20 : vector<12x32xf32>
    %22 = vector.extract_strided_slice %10 {offsets = [0, 32], sizes = [12, 32], strides = [1, 1]} : vector<12x96xf32> to vector<12x32xf32>
    %23 = vector.extract_strided_slice %13 {offsets = [0, 32], sizes = [12, 32], strides = [1, 1]} : vector<12x96xf32> to vector<12x32xf32>
    %24 = arith.addf %22, %23 : vector<12x32xf32>
    %25 = arith.negf %24 : vector<12x32xf32>
    %26 = math.exp %25 : vector<12x32xf32>
    %cst_12 = arith.constant 1.000000e+00 : f32
    %27 = vector.broadcast %cst_12 : f32 to vector<12x32xf32>
    %28 = arith.addf %27, %26 : vector<12x32xf32>
    %29 = arith.divf %27, %28 : vector<12x32xf32>
    %30 = vector.extract_strided_slice %10 {offsets = [0, 64], sizes = [12, 32], strides = [1, 1]} : vector<12x96xf32> to vector<12x32xf32>
    %31 = vector.extract_strided_slice %13 {offsets = [0, 64], sizes = [12, 32], strides = [1, 1]} : vector<12x96xf32> to vector<12x32xf32>
    %32 = arith.mulf %21, %31 : vector<12x32xf32>
    %33 = arith.addf %30, %32 : vector<12x32xf32>
    %34 = math.tanh %33 : vector<12x32xf32>
    %cst_13 = arith.constant 1.000000e+00 : f32
    %35 = vector.broadcast %cst_13 : f32 to vector<12x32xf32>
    %36 = arith.subf %35, %29 : vector<12x32xf32>
    %37 = arith.mulf %36, %34 : vector<12x32xf32>
    %38 = arith.mulf %29, %4 : vector<12x32xf32>
    %39 = arith.addf %37, %38 : vector<12x32xf32>
    %c1_i32 = arith.constant 1 : i32
    %40 = arith.index_cast %c1_i32 : i32 to index
    %c0_14 = arith.constant 0 : index
    %c0_15 = arith.constant 0 : index
    %41 = vector.load %arg0[%40, %c0_14, %c0_15] : memref<6x12x32xf32, #tpu.memory_space<vmem>>, vector<1x12x32xf32>
    %42 = vector.shape_cast %41 : vector<1x12x32xf32> to vector<12x32xf32>
    %cst_16 = arith.constant dense<0.000000e+00> : vector<12x96xf32>
    %43 = tpu.matmul %42, %0, %cst_16 {dimension_numbers = #tpu.dot_dimension_numbers<[1], [0], [0], [1], [0, 0, 1, 1], [], []>} : vector<12x32xf32>, vector<32x96xf32>, vector<12x96xf32> -> vector<12x96xf32>
    %44 = vector.broadcast %2 : vector<1x96xf32> to vector<12x96xf32>
    %45 = arith.addf %43, %44 : vector<12x96xf32>
    %cst_17 = arith.constant dense<0.000000e+00> : vector<12x96xf32>
    %46 = tpu.matmul %39, %1, %cst_17 {dimension_numbers = #tpu.dot_dimension_numbers<[1], [0], [0], [1], [0, 0, 1, 1], [], []>} : vector<12x32xf32>, vector<32x96xf32>, vector<12x96xf32> -> vector<12x96xf32>
    %47 = vector.broadcast %3 : vector<1x96xf32> to vector<12x96xf32>
    %48 = arith.addf %46, %47 : vector<12x96xf32>
    %49 = vector.extract_strided_slice %45 {offsets = [0, 0], sizes = [12, 32], strides = [1, 1]} : vector<12x96xf32> to vector<12x32xf32>
    %50 = vector.extract_strided_slice %48 {offsets = [0, 0], sizes = [12, 32], strides = [1, 1]} : vector<12x96xf32> to vector<12x32xf32>
    %51 = arith.addf %49, %50 : vector<12x32xf32>
    %52 = arith.negf %51 : vector<12x32xf32>
    %53 = math.exp %52 : vector<12x32xf32>
    %cst_18 = arith.constant 1.000000e+00 : f32
    %54 = vector.broadcast %cst_18 : f32 to vector<12x32xf32>
    %55 = arith.addf %54, %53 : vector<12x32xf32>
    %56 = arith.divf %54, %55 : vector<12x32xf32>
    %57 = vector.extract_strided_slice %45 {offsets = [0, 32], sizes = [12, 32], strides = [1, 1]} : vector<12x96xf32> to vector<12x32xf32>
    %58 = vector.extract_strided_slice %48 {offsets = [0, 32], sizes = [12, 32], strides = [1, 1]} : vector<12x96xf32> to vector<12x32xf32>
    %59 = arith.addf %57, %58 : vector<12x32xf32>
    %60 = arith.negf %59 : vector<12x32xf32>
    %61 = math.exp %60 : vector<12x32xf32>
    %cst_19 = arith.constant 1.000000e+00 : f32
    %62 = vector.broadcast %cst_19 : f32 to vector<12x32xf32>
    %63 = arith.addf %62, %61 : vector<12x32xf32>
    %64 = arith.divf %62, %63 : vector<12x32xf32>
    %65 = vector.extract_strided_slice %45 {offsets = [0, 64], sizes = [12, 32], strides = [1, 1]} : vector<12x96xf32> to vector<12x32xf32>
    %66 = vector.extract_strided_slice %48 {offsets = [0, 64], sizes = [12, 32], strides = [1, 1]} : vector<12x96xf32> to vector<12x32xf32>
    %67 = arith.mulf %56, %66 : vector<12x32xf32>
    %68 = arith.addf %65, %67 : vector<12x32xf32>
    %69 = math.tanh %68 : vector<12x32xf32>
    %cst_20 = arith.constant 1.000000e+00 : f32
    %70 = vector.broadcast %cst_20 : f32 to vector<12x32xf32>
    %71 = arith.subf %70, %64 : vector<12x32xf32>
    %72 = arith.mulf %71, %69 : vector<12x32xf32>
    %73 = arith.mulf %64, %39 : vector<12x32xf32>
    %74 = arith.addf %72, %73 : vector<12x32xf32>
    %c2_i32 = arith.constant 2 : i32
    %75 = arith.index_cast %c2_i32 : i32 to index
    %c0_21 = arith.constant 0 : index
    %c0_22 = arith.constant 0 : index
    %76 = vector.load %arg0[%75, %c0_21, %c0_22] : memref<6x12x32xf32, #tpu.memory_space<vmem>>, vector<1x12x32xf32>
    %77 = vector.shape_cast %76 : vector<1x12x32xf32> to vector<12x32xf32>
    %cst_23 = arith.constant dense<0.000000e+00> : vector<12x96xf32>
    %78 = tpu.matmul %77, %0, %cst_23 {dimension_numbers = #tpu.dot_dimension_numbers<[1], [0], [0], [1], [0, 0, 1, 1], [], []>} : vector<12x32xf32>, vector<32x96xf32>, vector<12x96xf32> -> vector<12x96xf32>
    %79 = vector.broadcast %2 : vector<1x96xf32> to vector<12x96xf32>
    %80 = arith.addf %78, %79 : vector<12x96xf32>
    %cst_24 = arith.constant dense<0.000000e+00> : vector<12x96xf32>
    %81 = tpu.matmul %74, %1, %cst_24 {dimension_numbers = #tpu.dot_dimension_numbers<[1], [0], [0], [1], [0, 0, 1, 1], [], []>} : vector<12x32xf32>, vector<32x96xf32>, vector<12x96xf32> -> vector<12x96xf32>
    %82 = vector.broadcast %3 : vector<1x96xf32> to vector<12x96xf32>
    %83 = arith.addf %81, %82 : vector<12x96xf32>
    %84 = vector.extract_strided_slice %80 {offsets = [0, 0], sizes = [12, 32], strides = [1, 1]} : vector<12x96xf32> to vector<12x32xf32>
    %85 = vector.extract_strided_slice %83 {offsets = [0, 0], sizes = [12, 32], strides = [1, 1]} : vector<12x96xf32> to vector<12x32xf32>
    %86 = arith.addf %84, %85 : vector<12x32xf32>
    %87 = arith.negf %86 : vector<12x32xf32>
    %88 = math.exp %87 : vector<12x32xf32>
    %cst_25 = arith.constant 1.000000e+00 : f32
    %89 = vector.broadcast %cst_25 : f32 to vector<12x32xf32>
    %90 = arith.addf %89, %88 : vector<12x32xf32>
    %91 = arith.divf %89, %90 : vector<12x32xf32>
    %92 = vector.extract_strided_slice %80 {offsets = [0, 32], sizes = [12, 32], strides = [1, 1]} : vector<12x96xf32> to vector<12x32xf32>
    %93 = vector.extract_strided_slice %83 {offsets = [0, 32], sizes = [12, 32], strides = [1, 1]} : vector<12x96xf32> to vector<12x32xf32>
    %94 = arith.addf %92, %93 : vector<12x32xf32>
    %95 = arith.negf %94 : vector<12x32xf32>
    %96 = math.exp %95 : vector<12x32xf32>
    %cst_26 = arith.constant 1.000000e+00 : f32
    %97 = vector.broadcast %cst_26 : f32 to vector<12x32xf32>
    %98 = arith.addf %97, %96 : vector<12x32xf32>
    %99 = arith.divf %97, %98 : vector<12x32xf32>
    %100 = vector.extract_strided_slice %80 {offsets = [0, 64], sizes = [12, 32], strides = [1, 1]} : vector<12x96xf32> to vector<12x32xf32>
    %101 = vector.extract_strided_slice %83 {offsets = [0, 64], sizes = [12, 32], strides = [1, 1]} : vector<12x96xf32> to vector<12x32xf32>
    %102 = arith.mulf %91, %101 : vector<12x32xf32>
    %103 = arith.addf %100, %102 : vector<12x32xf32>
    %104 = math.tanh %103 : vector<12x32xf32>
    %cst_27 = arith.constant 1.000000e+00 : f32
    %105 = vector.broadcast %cst_27 : f32 to vector<12x32xf32>
    %106 = arith.subf %105, %99 : vector<12x32xf32>
    %107 = arith.mulf %106, %104 : vector<12x32xf32>
    %108 = arith.mulf %99, %74 : vector<12x32xf32>
    %109 = arith.addf %107, %108 : vector<12x32xf32>
    %c3_i32 = arith.constant 3 : i32
    %110 = arith.index_cast %c3_i32 : i32 to index
    %c0_28 = arith.constant 0 : index
    %c0_29 = arith.constant 0 : index
    %111 = vector.load %arg0[%110, %c0_28, %c0_29] : memref<6x12x32xf32, #tpu.memory_space<vmem>>, vector<1x12x32xf32>
    %112 = vector.shape_cast %111 : vector<1x12x32xf32> to vector<12x32xf32>
    %cst_30 = arith.constant dense<0.000000e+00> : vector<12x96xf32>
    %113 = tpu.matmul %112, %0, %cst_30 {dimension_numbers = #tpu.dot_dimension_numbers<[1], [0], [0], [1], [0, 0, 1, 1], [], []>} : vector<12x32xf32>, vector<32x96xf32>, vector<12x96xf32> -> vector<12x96xf32>
    %114 = vector.broadcast %2 : vector<1x96xf32> to vector<12x96xf32>
    %115 = arith.addf %113, %114 : vector<12x96xf32>
    %cst_31 = arith.constant dense<0.000000e+00> : vector<12x96xf32>
    %116 = tpu.matmul %109, %1, %cst_31 {dimension_numbers = #tpu.dot_dimension_numbers<[1], [0], [0], [1], [0, 0, 1, 1], [], []>} : vector<12x32xf32>, vector<32x96xf32>, vector<12x96xf32> -> vector<12x96xf32>
    %117 = vector.broadcast %3 : vector<1x96xf32> to vector<12x96xf32>
    %118 = arith.addf %116, %117 : vector<12x96xf32>
    %119 = vector.extract_strided_slice %115 {offsets = [0, 0], sizes = [12, 32], strides = [1, 1]} : vector<12x96xf32> to vector<12x32xf32>
    %120 = vector.extract_strided_slice %118 {offsets = [0, 0], sizes = [12, 32], strides = [1, 1]} : vector<12x96xf32> to vector<12x32xf32>
    %121 = arith.addf %119, %120 : vector<12x32xf32>
    %122 = arith.negf %121 : vector<12x32xf32>
    %123 = math.exp %122 : vector<12x32xf32>
    %cst_32 = arith.constant 1.000000e+00 : f32
    %124 = vector.broadcast %cst_32 : f32 to vector<12x32xf32>
    %125 = arith.addf %124, %123 : vector<12x32xf32>
    %126 = arith.divf %124, %125 : vector<12x32xf32>
    %127 = vector.extract_strided_slice %115 {offsets = [0, 32], sizes = [12, 32], strides = [1, 1]} : vector<12x96xf32> to vector<12x32xf32>
    %128 = vector.extract_strided_slice %118 {offsets = [0, 32], sizes = [12, 32], strides = [1, 1]} : vector<12x96xf32> to vector<12x32xf32>
    %129 = arith.addf %127, %128 : vector<12x32xf32>
    %130 = arith.negf %129 : vector<12x32xf32>
    %131 = math.exp %130 : vector<12x32xf32>
    %cst_33 = arith.constant 1.000000e+00 : f32
    %132 = vector.broadcast %cst_33 : f32 to vector<12x32xf32>
    %133 = arith.addf %132, %131 : vector<12x32xf32>
    %134 = arith.divf %132, %133 : vector<12x32xf32>
    %135 = vector.extract_strided_slice %115 {offsets = [0, 64], sizes = [12, 32], strides = [1, 1]} : vector<12x96xf32> to vector<12x32xf32>
    %136 = vector.extract_strided_slice %118 {offsets = [0, 64], sizes = [12, 32], strides = [1, 1]} : vector<12x96xf32> to vector<12x32xf32>
    %137 = arith.mulf %126, %136 : vector<12x32xf32>
    %138 = arith.addf %135, %137 : vector<12x32xf32>
    %139 = math.tanh %138 : vector<12x32xf32>
    %cst_34 = arith.constant 1.000000e+00 : f32
    %140 = vector.broadcast %cst_34 : f32 to vector<12x32xf32>
    %141 = arith.subf %140, %134 : vector<12x32xf32>
    %142 = arith.mulf %141, %139 : vector<12x32xf32>
    %143 = arith.mulf %134, %109 : vector<12x32xf32>
    %144 = arith.addf %142, %143 : vector<12x32xf32>
    %c4_i32 = arith.constant 4 : i32
    %145 = arith.index_cast %c4_i32 : i32 to index
    %c0_35 = arith.constant 0 : index
    %c0_36 = arith.constant 0 : index
    %146 = vector.load %arg0[%145, %c0_35, %c0_36] : memref<6x12x32xf32, #tpu.memory_space<vmem>>, vector<1x12x32xf32>
    %147 = vector.shape_cast %146 : vector<1x12x32xf32> to vector<12x32xf32>
    %cst_37 = arith.constant dense<0.000000e+00> : vector<12x96xf32>
    %148 = tpu.matmul %147, %0, %cst_37 {dimension_numbers = #tpu.dot_dimension_numbers<[1], [0], [0], [1], [0, 0, 1, 1], [], []>} : vector<12x32xf32>, vector<32x96xf32>, vector<12x96xf32> -> vector<12x96xf32>
    %149 = vector.broadcast %2 : vector<1x96xf32> to vector<12x96xf32>
    %150 = arith.addf %148, %149 : vector<12x96xf32>
    %cst_38 = arith.constant dense<0.000000e+00> : vector<12x96xf32>
    %151 = tpu.matmul %144, %1, %cst_38 {dimension_numbers = #tpu.dot_dimension_numbers<[1], [0], [0], [1], [0, 0, 1, 1], [], []>} : vector<12x32xf32>, vector<32x96xf32>, vector<12x96xf32> -> vector<12x96xf32>
    %152 = vector.broadcast %3 : vector<1x96xf32> to vector<12x96xf32>
    %153 = arith.addf %151, %152 : vector<12x96xf32>
    %154 = vector.extract_strided_slice %150 {offsets = [0, 0], sizes = [12, 32], strides = [1, 1]} : vector<12x96xf32> to vector<12x32xf32>
    %155 = vector.extract_strided_slice %153 {offsets = [0, 0], sizes = [12, 32], strides = [1, 1]} : vector<12x96xf32> to vector<12x32xf32>
    %156 = arith.addf %154, %155 : vector<12x32xf32>
    %157 = arith.negf %156 : vector<12x32xf32>
    %158 = math.exp %157 : vector<12x32xf32>
    %cst_39 = arith.constant 1.000000e+00 : f32
    %159 = vector.broadcast %cst_39 : f32 to vector<12x32xf32>
    %160 = arith.addf %159, %158 : vector<12x32xf32>
    %161 = arith.divf %159, %160 : vector<12x32xf32>
    %162 = vector.extract_strided_slice %150 {offsets = [0, 32], sizes = [12, 32], strides = [1, 1]} : vector<12x96xf32> to vector<12x32xf32>
    %163 = vector.extract_strided_slice %153 {offsets = [0, 32], sizes = [12, 32], strides = [1, 1]} : vector<12x96xf32> to vector<12x32xf32>
    %164 = arith.addf %162, %163 : vector<12x32xf32>
    %165 = arith.negf %164 : vector<12x32xf32>
    %166 = math.exp %165 : vector<12x32xf32>
    %cst_40 = arith.constant 1.000000e+00 : f32
    %167 = vector.broadcast %cst_40 : f32 to vector<12x32xf32>
    %168 = arith.addf %167, %166 : vector<12x32xf32>
    %169 = arith.divf %167, %168 : vector<12x32xf32>
    %170 = vector.extract_strided_slice %150 {offsets = [0, 64], sizes = [12, 32], strides = [1, 1]} : vector<12x96xf32> to vector<12x32xf32>
    %171 = vector.extract_strided_slice %153 {offsets = [0, 64], sizes = [12, 32], strides = [1, 1]} : vector<12x96xf32> to vector<12x32xf32>
    %172 = arith.mulf %161, %171 : vector<12x32xf32>
    %173 = arith.addf %170, %172 : vector<12x32xf32>
    %174 = math.tanh %173 : vector<12x32xf32>
    %cst_41 = arith.constant 1.000000e+00 : f32
    %175 = vector.broadcast %cst_41 : f32 to vector<12x32xf32>
    %176 = arith.subf %175, %169 : vector<12x32xf32>
    %177 = arith.mulf %176, %174 : vector<12x32xf32>
    %178 = arith.mulf %169, %144 : vector<12x32xf32>
    %179 = arith.addf %177, %178 : vector<12x32xf32>
    %c5_i32 = arith.constant 5 : i32
    %180 = arith.index_cast %c5_i32 : i32 to index
    %c0_42 = arith.constant 0 : index
    %c0_43 = arith.constant 0 : index
    %181 = vector.load %arg0[%180, %c0_42, %c0_43] : memref<6x12x32xf32, #tpu.memory_space<vmem>>, vector<1x12x32xf32>
    %182 = vector.shape_cast %181 : vector<1x12x32xf32> to vector<12x32xf32>
    %cst_44 = arith.constant dense<0.000000e+00> : vector<12x96xf32>
    %183 = tpu.matmul %182, %0, %cst_44 {dimension_numbers = #tpu.dot_dimension_numbers<[1], [0], [0], [1], [0, 0, 1, 1], [], []>} : vector<12x32xf32>, vector<32x96xf32>, vector<12x96xf32> -> vector<12x96xf32>
    %184 = vector.broadcast %2 : vector<1x96xf32> to vector<12x96xf32>
    %185 = arith.addf %183, %184 : vector<12x96xf32>
    %cst_45 = arith.constant dense<0.000000e+00> : vector<12x96xf32>
    %186 = tpu.matmul %179, %1, %cst_45 {dimension_numbers = #tpu.dot_dimension_numbers<[1], [0], [0], [1], [0, 0, 1, 1], [], []>} : vector<12x32xf32>, vector<32x96xf32>, vector<12x96xf32> -> vector<12x96xf32>
    %187 = vector.broadcast %3 : vector<1x96xf32> to vector<12x96xf32>
    %188 = arith.addf %186, %187 : vector<12x96xf32>
    %189 = vector.extract_strided_slice %185 {offsets = [0, 0], sizes = [12, 32], strides = [1, 1]} : vector<12x96xf32> to vector<12x32xf32>
    %190 = vector.extract_strided_slice %188 {offsets = [0, 0], sizes = [12, 32], strides = [1, 1]} : vector<12x96xf32> to vector<12x32xf32>
    %191 = arith.addf %189, %190 : vector<12x32xf32>
    %192 = arith.negf %191 : vector<12x32xf32>
    %193 = math.exp %192 : vector<12x32xf32>
    %cst_46 = arith.constant 1.000000e+00 : f32
    %194 = vector.broadcast %cst_46 : f32 to vector<12x32xf32>
    %195 = arith.addf %194, %193 : vector<12x32xf32>
    %196 = arith.divf %194, %195 : vector<12x32xf32>
    %197 = vector.extract_strided_slice %185 {offsets = [0, 32], sizes = [12, 32], strides = [1, 1]} : vector<12x96xf32> to vector<12x32xf32>
    %198 = vector.extract_strided_slice %188 {offsets = [0, 32], sizes = [12, 32], strides = [1, 1]} : vector<12x96xf32> to vector<12x32xf32>
    %199 = arith.addf %197, %198 : vector<12x32xf32>
    %200 = arith.negf %199 : vector<12x32xf32>
    %201 = math.exp %200 : vector<12x32xf32>
    %cst_47 = arith.constant 1.000000e+00 : f32
    %202 = vector.broadcast %cst_47 : f32 to vector<12x32xf32>
    %203 = arith.addf %202, %201 : vector<12x32xf32>
    %204 = arith.divf %202, %203 : vector<12x32xf32>
    %205 = vector.extract_strided_slice %185 {offsets = [0, 64], sizes = [12, 32], strides = [1, 1]} : vector<12x96xf32> to vector<12x32xf32>
    %206 = vector.extract_strided_slice %188 {offsets = [0, 64], sizes = [12, 32], strides = [1, 1]} : vector<12x96xf32> to vector<12x32xf32>
    %207 = arith.mulf %196, %206 : vector<12x32xf32>
    %208 = arith.addf %205, %207 : vector<12x32xf32>
    %209 = math.tanh %208 : vector<12x32xf32>
    %cst_48 = arith.constant 1.000000e+00 : f32
    %210 = vector.broadcast %cst_48 : f32 to vector<12x32xf32>
    %211 = arith.subf %210, %204 : vector<12x32xf32>
    %212 = arith.mulf %211, %209 : vector<12x32xf32>
    %213 = arith.mulf %204, %179 : vector<12x32xf32>
    %214 = arith.addf %212, %213 : vector<12x32xf32>
    %c6_i32 = arith.constant 6 : i32
    %215 = vector.extract_strided_slice %214 {offsets = [8, 0], sizes = [4, 32], strides = [1, 1]} : vector<12x32xf32> to vector<4x32xf32>
    %c0_49 = arith.constant 0 : index
    %c0_50 = arith.constant 0 : index
    %216 = vector.load %arg5[%c0_49, %c0_50] : memref<12x1xf32, #tpu.memory_space<vmem>>, vector<12x1xf32>
    %cst_51 = arith.constant 5.000000e-01 : f32
    %217 = vector.broadcast %cst_51 : f32 to vector<12x1xf32>
    %218 = arith.cmpf ogt, %216, %217 : vector<12x1xf32>
    %c0_52 = arith.constant 0 : index
    %c0_53 = arith.constant 0 : index
    %219 = vector.load %arg7[%c0_52, %c0_53] : memref<32x32xf32, #tpu.memory_space<vmem>>, vector<32x32xf32>
    %cst_54 = arith.constant dense<0.000000e+00> : vector<12x32xf32>
    %220 = tpu.matmul %214, %219, %cst_54 {dimension_numbers = #tpu.dot_dimension_numbers<[1], [0], [0], [1], [0, 0, 1, 1], [], []>} : vector<12x32xf32>, vector<32x32xf32>, vector<12x32xf32> -> vector<12x32xf32>
    %c0_55 = arith.constant 0 : index
    %c0_56 = arith.constant 0 : index
    %221 = vector.load %arg6[%c0_55, %c0_56] : memref<32x32xf32, #tpu.memory_space<vmem>>, vector<32x32xf32>
    %c0_57 = arith.constant 0 : index
    %c0_58 = arith.constant 0 : index
    %222 = vector.load %arg8[%c0_57, %c0_58] : memref<32x1xf32, #tpu.memory_space<vmem>>, vector<32x1xf32>
    %cst_59 = arith.constant dense<0.000000e+00> : vector<4x32xf32>
    %223 = tpu.matmul %215, %221, %cst_59 {dimension_numbers = #tpu.dot_dimension_numbers<[1], [0], [0], [1], [0, 0, 1, 1], [], []>} : vector<4x32xf32>, vector<32x32xf32>, vector<4x32xf32> -> vector<4x32xf32>
    %224 = tpu.concatenate %223, %223, %223 in 0 : vector<4x32xf32>, vector<4x32xf32>, vector<4x32xf32> -> vector<12x32xf32>
    %225 = arith.addf %224, %220 : vector<12x32xf32>
    %226 = math.tanh %225 : vector<12x32xf32>
    %cst_60 = arith.constant dense<0.000000e+00> : vector<12x1xf32>
    %227 = tpu.matmul %226, %222, %cst_60 {dimension_numbers = #tpu.dot_dimension_numbers<[1], [0], [0], [1], [0, 0, 1, 1], [], []>} : vector<12x32xf32>, vector<32x1xf32>, vector<12x1xf32> -> vector<12x1xf32>
    %cst_61 = arith.constant -1.000000e+05 : f32
    %228 = vector.broadcast %cst_61 : f32 to vector<12x1xf32>
    %229 = arith.select %218, %228, %227 : vector<12x1xi1>, vector<12x1xf32>
    %230 = vector.extract_strided_slice %229 {offsets = [0, 0], sizes = [4, 1], strides = [1, 1]} : vector<12x1xf32> to vector<4x1xf32>
    %231 = vector.extract_strided_slice %229 {offsets = [4, 0], sizes = [4, 1], strides = [1, 1]} : vector<12x1xf32> to vector<4x1xf32>
    %232 = arith.maximumf %230, %231 : vector<4x1xf32>
    %233 = vector.extract_strided_slice %229 {offsets = [8, 0], sizes = [4, 1], strides = [1, 1]} : vector<12x1xf32> to vector<4x1xf32>
    %234 = arith.maximumf %232, %233 : vector<4x1xf32>
    %235 = tpu.concatenate %234, %234, %234 in 0 : vector<4x1xf32>, vector<4x1xf32>, vector<4x1xf32> -> vector<12x1xf32>
    %236 = arith.subf %229, %235 : vector<12x1xf32>
    %237 = math.exp %236 : vector<12x1xf32>
    %238 = vector.extract_strided_slice %237 {offsets = [0, 0], sizes = [4, 1], strides = [1, 1]} : vector<12x1xf32> to vector<4x1xf32>
    %239 = vector.extract_strided_slice %237 {offsets = [4, 0], sizes = [4, 1], strides = [1, 1]} : vector<12x1xf32> to vector<4x1xf32>
    %240 = arith.addf %238, %239 : vector<4x1xf32>
    %241 = vector.extract_strided_slice %237 {offsets = [8, 0], sizes = [4, 1], strides = [1, 1]} : vector<12x1xf32> to vector<4x1xf32>
    %242 = arith.addf %240, %241 : vector<4x1xf32>
    %243 = tpu.concatenate %242, %242, %242 in 0 : vector<4x1xf32>, vector<4x1xf32>, vector<4x1xf32> -> vector<12x1xf32>
    %244 = arith.divf %237, %243 : vector<12x1xf32>
    %245 = vector.broadcast %244 : vector<12x1xf32> to vector<12x32xf32>
    %246 = arith.mulf %245, %214 : vector<12x32xf32>
    %247 = vector.extract_strided_slice %246 {offsets = [0, 0], sizes = [4, 32], strides = [1, 1]} : vector<12x32xf32> to vector<4x32xf32>
    %248 = vector.extract_strided_slice %246 {offsets = [4, 0], sizes = [4, 32], strides = [1, 1]} : vector<12x32xf32> to vector<4x32xf32>
    %249 = arith.addf %247, %248 : vector<4x32xf32>
    %250 = vector.extract_strided_slice %246 {offsets = [8, 0], sizes = [4, 32], strides = [1, 1]} : vector<12x32xf32> to vector<4x32xf32>
    %251 = arith.addf %249, %250 : vector<4x32xf32>
    %c0_62 = arith.constant 0 : index
    %c0_63 = arith.constant 0 : index
    %252 = vector.load %arg10[%c0_62, %c0_63] : memref<32x32xf32, #tpu.memory_space<vmem>>, vector<32x32xf32>
    %cst_64 = arith.constant dense<0.000000e+00> : vector<12x32xf32>
    %253 = tpu.matmul %214, %252, %cst_64 {dimension_numbers = #tpu.dot_dimension_numbers<[1], [0], [0], [1], [0, 0, 1, 1], [], []>} : vector<12x32xf32>, vector<32x32xf32>, vector<12x32xf32> -> vector<12x32xf32>
    %c0_65 = arith.constant 0 : index
    %c0_66 = arith.constant 0 : index
    %254 = vector.load %arg9[%c0_65, %c0_66] : memref<32x32xf32, #tpu.memory_space<vmem>>, vector<32x32xf32>
    %c0_67 = arith.constant 0 : index
    %c0_68 = arith.constant 0 : index
    %255 = vector.load %arg11[%c0_67, %c0_68] : memref<32x1xf32, #tpu.memory_space<vmem>>, vector<32x1xf32>
    %c0_69 = arith.constant 0 : index
    %c0_70 = arith.constant 0 : index
    %256 = vector.load %arg13[%c0_69, %c0_70] : memref<80x96xf32, #tpu.memory_space<vmem>>, vector<80x96xf32>
    %c0_71 = arith.constant 0 : index
    %c0_72 = arith.constant 0 : index
    %257 = vector.load %arg14[%c0_71, %c0_72] : memref<32x96xf32, #tpu.memory_space<vmem>>, vector<32x96xf32>
    %c0_73 = arith.constant 0 : index
    %c0_74 = arith.constant 0 : index
    %258 = vector.load %arg15[%c0_73, %c0_74] : memref<1x96xf32, #tpu.memory_space<vmem>>, vector<1x96xf32>
    %c0_75 = arith.constant 0 : index
    %c0_76 = arith.constant 0 : index
    %259 = vector.load %arg16[%c0_75, %c0_76] : memref<1x96xf32, #tpu.memory_space<vmem>>, vector<1x96xf32>
    %c0_77 = arith.constant 0 : index
    %c0_78 = arith.constant 0 : index
    %260 = vector.load %arg17[%c0_77, %c0_78] : memref<32x32xf32, #tpu.memory_space<vmem>>, vector<32x32xf32>
    %c0_79 = arith.constant 0 : index
    %c0_80 = arith.constant 0 : index
    %261 = vector.load %arg18[%c0_79, %c0_80] : memref<1x32xf32, #tpu.memory_space<vmem>>, vector<1x32xf32>
    %cst_81 = arith.constant dense<0.000000e+00> : vector<4x32xf32>
    %262 = tpu.matmul %215, %254, %cst_81 {dimension_numbers = #tpu.dot_dimension_numbers<[1], [0], [0], [1], [0, 0, 1, 1], [], []>} : vector<4x32xf32>, vector<32x32xf32>, vector<4x32xf32> -> vector<4x32xf32>
    %263 = tpu.concatenate %262, %262, %262 in 0 : vector<4x32xf32>, vector<4x32xf32>, vector<4x32xf32> -> vector<12x32xf32>
    %264 = arith.addf %263, %253 : vector<12x32xf32>
    %265 = math.tanh %264 : vector<12x32xf32>
    %cst_82 = arith.constant dense<0.000000e+00> : vector<12x1xf32>
    %266 = tpu.matmul %265, %255, %cst_82 {dimension_numbers = #tpu.dot_dimension_numbers<[1], [0], [0], [1], [0, 0, 1, 1], [], []>} : vector<12x32xf32>, vector<32x1xf32>, vector<12x1xf32> -> vector<12x1xf32>
    %cst_83 = arith.constant -1.000000e+05 : f32
    %267 = vector.broadcast %cst_83 : f32 to vector<12x1xf32>
    %268 = arith.select %218, %267, %266 : vector<12x1xi1>, vector<12x1xf32>
    %269 = vector.extract_strided_slice %268 {offsets = [0, 0], sizes = [4, 1], strides = [1, 1]} : vector<12x1xf32> to vector<4x1xf32>
    %270 = vector.extract_strided_slice %268 {offsets = [4, 0], sizes = [4, 1], strides = [1, 1]} : vector<12x1xf32> to vector<4x1xf32>
    %271 = arith.maximumf %269, %270 : vector<4x1xf32>
    %272 = vector.extract_strided_slice %268 {offsets = [8, 0], sizes = [4, 1], strides = [1, 1]} : vector<12x1xf32> to vector<4x1xf32>
    %273 = arith.maximumf %271, %272 : vector<4x1xf32>
    %274 = tpu.concatenate %273, %273, %273 in 0 : vector<4x1xf32>, vector<4x1xf32>, vector<4x1xf32> -> vector<12x1xf32>
    %275 = arith.subf %268, %274 : vector<12x1xf32>
    %276 = math.exp %275 : vector<12x1xf32>
    %277 = vector.extract_strided_slice %276 {offsets = [0, 0], sizes = [4, 1], strides = [1, 1]} : vector<12x1xf32> to vector<4x1xf32>
    %278 = vector.extract_strided_slice %276 {offsets = [4, 0], sizes = [4, 1], strides = [1, 1]} : vector<12x1xf32> to vector<4x1xf32>
    %279 = arith.addf %277, %278 : vector<4x1xf32>
    %280 = vector.extract_strided_slice %276 {offsets = [8, 0], sizes = [4, 1], strides = [1, 1]} : vector<12x1xf32> to vector<4x1xf32>
    %281 = arith.addf %279, %280 : vector<4x1xf32>
    %282 = tpu.concatenate %281, %281, %281 in 0 : vector<4x1xf32>, vector<4x1xf32>, vector<4x1xf32> -> vector<12x1xf32>
    %283 = arith.divf %276, %282 : vector<12x1xf32>
    %284 = vector.broadcast %283 : vector<12x1xf32> to vector<12x32xf32>
    %285 = arith.mulf %284, %214 : vector<12x32xf32>
    %286 = vector.extract_strided_slice %285 {offsets = [0, 0], sizes = [4, 32], strides = [1, 1]} : vector<12x32xf32> to vector<4x32xf32>
    %287 = vector.extract_strided_slice %285 {offsets = [4, 0], sizes = [4, 32], strides = [1, 1]} : vector<12x32xf32> to vector<4x32xf32>
    %288 = arith.addf %286, %287 : vector<4x32xf32>
    %289 = vector.extract_strided_slice %285 {offsets = [8, 0], sizes = [4, 32], strides = [1, 1]} : vector<12x32xf32> to vector<4x32xf32>
    %290 = arith.addf %288, %289 : vector<4x32xf32>
    %c0_84 = arith.constant 0 : index
    %c0_85 = arith.constant 0 : index
    %c0_86 = arith.constant 0 : index
    %291 = vector.load %arg12[%c0_84, %c0_85, %c0_86] : memref<3x4x16xf32, #tpu.memory_space<vmem>>, vector<1x4x16xf32>
    %292 = vector.shape_cast %291 : vector<1x4x16xf32> to vector<4x16xf32>
    %293 = tpu.concatenate %292, %251, %290 in 1 : vector<4x16xf32>, vector<4x32xf32>, vector<4x32xf32> -> vector<4x80xf32>
    %cst_87 = arith.constant dense<0.000000e+00> : vector<4x96xf32>
    %294 = tpu.matmul %293, %256, %cst_87 {dimension_numbers = #tpu.dot_dimension_numbers<[1], [0], [0], [1], [0, 0, 1, 1], [], []>} : vector<4x80xf32>, vector<80x96xf32>, vector<4x96xf32> -> vector<4x96xf32>
    %295 = vector.broadcast %258 : vector<1x96xf32> to vector<4x96xf32>
    %296 = arith.addf %294, %295 : vector<4x96xf32>
    %cst_88 = arith.constant dense<0.000000e+00> : vector<4x96xf32>
    %297 = tpu.matmul %215, %257, %cst_88 {dimension_numbers = #tpu.dot_dimension_numbers<[1], [0], [0], [1], [0, 0, 1, 1], [], []>} : vector<4x32xf32>, vector<32x96xf32>, vector<4x96xf32> -> vector<4x96xf32>
    %298 = vector.broadcast %259 : vector<1x96xf32> to vector<4x96xf32>
    %299 = arith.addf %297, %298 : vector<4x96xf32>
    %300 = vector.extract_strided_slice %296 {offsets = [0, 0], sizes = [4, 32], strides = [1, 1]} : vector<4x96xf32> to vector<4x32xf32>
    %301 = vector.extract_strided_slice %299 {offsets = [0, 0], sizes = [4, 32], strides = [1, 1]} : vector<4x96xf32> to vector<4x32xf32>
    %302 = arith.addf %300, %301 : vector<4x32xf32>
    %303 = arith.negf %302 : vector<4x32xf32>
    %304 = math.exp %303 : vector<4x32xf32>
    %cst_89 = arith.constant 1.000000e+00 : f32
    %305 = vector.broadcast %cst_89 : f32 to vector<4x32xf32>
    %306 = arith.addf %305, %304 : vector<4x32xf32>
    %307 = arith.divf %305, %306 : vector<4x32xf32>
    %308 = vector.extract_strided_slice %296 {offsets = [0, 32], sizes = [4, 32], strides = [1, 1]} : vector<4x96xf32> to vector<4x32xf32>
    %309 = vector.extract_strided_slice %299 {offsets = [0, 32], sizes = [4, 32], strides = [1, 1]} : vector<4x96xf32> to vector<4x32xf32>
    %310 = arith.addf %308, %309 : vector<4x32xf32>
    %311 = arith.negf %310 : vector<4x32xf32>
    %312 = math.exp %311 : vector<4x32xf32>
    %cst_90 = arith.constant 1.000000e+00 : f32
    %313 = vector.broadcast %cst_90 : f32 to vector<4x32xf32>
    %314 = arith.addf %313, %312 : vector<4x32xf32>
    %315 = arith.divf %313, %314 : vector<4x32xf32>
    %316 = vector.extract_strided_slice %296 {offsets = [0, 64], sizes = [4, 32], strides = [1, 1]} : vector<4x96xf32> to vector<4x32xf32>
    %317 = vector.extract_strided_slice %299 {offsets = [0, 64], sizes = [4, 32], strides = [1, 1]} : vector<4x96xf32> to vector<4x32xf32>
    %318 = arith.mulf %307, %317 : vector<4x32xf32>
    %319 = arith.addf %316, %318 : vector<4x32xf32>
    %320 = math.tanh %319 : vector<4x32xf32>
    %cst_91 = arith.constant 1.000000e+00 : f32
    %321 = vector.broadcast %cst_91 : f32 to vector<4x32xf32>
    %322 = arith.subf %321, %315 : vector<4x32xf32>
    %323 = arith.mulf %322, %320 : vector<4x32xf32>
    %324 = arith.mulf %315, %215 : vector<4x32xf32>
    %325 = arith.addf %323, %324 : vector<4x32xf32>
    %cst_92 = arith.constant dense<0.000000e+00> : vector<4x32xf32>
    %326 = tpu.matmul %325, %260, %cst_92 {dimension_numbers = #tpu.dot_dimension_numbers<[1], [0], [0], [1], [0, 0, 1, 1], [], []>} : vector<4x32xf32>, vector<32x32xf32>, vector<4x32xf32> -> vector<4x32xf32>
    %327 = vector.broadcast %261 : vector<1x32xf32> to vector<4x32xf32>
    %328 = arith.addf %326, %327 : vector<4x32xf32>
    %cst_93 = arith.constant dense<0xFF800000> : vector<4xf32>
    %329 = vector.multi_reduction <maximumf>, %328, %cst_93 [1] : vector<4x32xf32> to vector<4xf32>
    %330 = vector.shape_cast %329 : vector<4xf32> to vector<4x1xf32>
    %331 = vector.broadcast %330 : vector<4x1xf32> to vector<4x32xf32>
    %332 = arith.subf %328, %331 : vector<4x32xf32>
    %333 = math.exp %332 : vector<4x32xf32>
    %cst_94 = arith.constant dense<0.000000e+00> : vector<4xf32>
    %334 = vector.multi_reduction <add>, %333, %cst_94 [1] : vector<4x32xf32> to vector<4xf32>
    %335 = vector.shape_cast %334 : vector<4xf32> to vector<4x1xf32>
    %336 = math.log %335 : vector<4x1xf32>
    %337 = vector.broadcast %336 : vector<4x1xf32> to vector<4x32xf32>
    %338 = arith.subf %332, %337 : vector<4x32xf32>
    %c0_95 = arith.constant 0 : index
    %c0_96 = arith.constant 0 : index
    %c0_97 = arith.constant 0 : index
    %339 = vector.load %arg19[%c0_95, %c0_96, %c0_97] : memref<3x4x32xf32, #tpu.memory_space<vmem>>, vector<1x4x32xf32>
    %340 = vector.shape_cast %339 : vector<1x4x32xf32> to vector<4x32xf32>
    %341 = vector.shape_cast %338 : vector<4x32xf32> to vector<1x4x32xf32>
    tpu.vector_store %arg19[%c0_95, %c0_96, %c0_97], %341 {strides = array<i32>} : memref<3x4x32xf32, #tpu.memory_space<vmem>>, vector<1x4x32xf32>,
    %cst_98 = arith.constant dense<0.000000e+00> : vector<4x32xf32>
    %342 = tpu.matmul %325, %254, %cst_98 {dimension_numbers = #tpu.dot_dimension_numbers<[1], [0], [0], [1], [0, 0, 1, 1], [], []>} : vector<4x32xf32>, vector<32x32xf32>, vector<4x32xf32> -> vector<4x32xf32>
    %343 = tpu.concatenate %342, %342, %342 in 0 : vector<4x32xf32>, vector<4x32xf32>, vector<4x32xf32> -> vector<12x32xf32>
    %344 = arith.addf %343, %253 : vector<12x32xf32>
    %345 = math.tanh %344 : vector<12x32xf32>
    %cst_99 = arith.constant dense<0.000000e+00> : vector<12x1xf32>
    %346 = tpu.matmul %345, %255, %cst_99 {dimension_numbers = #tpu.dot_dimension_numbers<[1], [0], [0], [1], [0, 0, 1, 1], [], []>} : vector<12x32xf32>, vector<32x1xf32>, vector<12x1xf32> -> vector<12x1xf32>
    %cst_100 = arith.constant -1.000000e+05 : f32
    %347 = vector.broadcast %cst_100 : f32 to vector<12x1xf32>
    %348 = arith.select %218, %347, %346 : vector<12x1xi1>, vector<12x1xf32>
    %349 = vector.extract_strided_slice %348 {offsets = [0, 0], sizes = [4, 1], strides = [1, 1]} : vector<12x1xf32> to vector<4x1xf32>
    %350 = vector.extract_strided_slice %348 {offsets = [4, 0], sizes = [4, 1], strides = [1, 1]} : vector<12x1xf32> to vector<4x1xf32>
    %351 = arith.maximumf %349, %350 : vector<4x1xf32>
    %352 = vector.extract_strided_slice %348 {offsets = [8, 0], sizes = [4, 1], strides = [1, 1]} : vector<12x1xf32> to vector<4x1xf32>
    %353 = arith.maximumf %351, %352 : vector<4x1xf32>
    %354 = tpu.concatenate %353, %353, %353 in 0 : vector<4x1xf32>, vector<4x1xf32>, vector<4x1xf32> -> vector<12x1xf32>
    %355 = arith.subf %348, %354 : vector<12x1xf32>
    %356 = math.exp %355 : vector<12x1xf32>
    %357 = vector.extract_strided_slice %356 {offsets = [0, 0], sizes = [4, 1], strides = [1, 1]} : vector<12x1xf32> to vector<4x1xf32>
    %358 = vector.extract_strided_slice %356 {offsets = [4, 0], sizes = [4, 1], strides = [1, 1]} : vector<12x1xf32> to vector<4x1xf32>
    %359 = arith.addf %357, %358 : vector<4x1xf32>
    %360 = vector.extract_strided_slice %356 {offsets = [8, 0], sizes = [4, 1], strides = [1, 1]} : vector<12x1xf32> to vector<4x1xf32>
    %361 = arith.addf %359, %360 : vector<4x1xf32>
    %362 = tpu.concatenate %361, %361, %361 in 0 : vector<4x1xf32>, vector<4x1xf32>, vector<4x1xf32> -> vector<12x1xf32>
    %363 = arith.divf %356, %362 : vector<12x1xf32>
    %364 = vector.broadcast %363 : vector<12x1xf32> to vector<12x32xf32>
    %365 = arith.mulf %364, %214 : vector<12x32xf32>
    %366 = vector.extract_strided_slice %365 {offsets = [0, 0], sizes = [4, 32], strides = [1, 1]} : vector<12x32xf32> to vector<4x32xf32>
    %367 = vector.extract_strided_slice %365 {offsets = [4, 0], sizes = [4, 32], strides = [1, 1]} : vector<12x32xf32> to vector<4x32xf32>
    %368 = arith.addf %366, %367 : vector<4x32xf32>
    %369 = vector.extract_strided_slice %365 {offsets = [8, 0], sizes = [4, 32], strides = [1, 1]} : vector<12x32xf32> to vector<4x32xf32>
    %370 = arith.addf %368, %369 : vector<4x32xf32>
    %c1 = arith.constant 1 : index
    %c0_101 = arith.constant 0 : index
    %c0_102 = arith.constant 0 : index
    %371 = vector.load %arg12[%c1, %c0_101, %c0_102] : memref<3x4x16xf32, #tpu.memory_space<vmem>>, vector<1x4x16xf32>
    %372 = vector.shape_cast %371 : vector<1x4x16xf32> to vector<4x16xf32>
    %373 = tpu.concatenate %372, %251, %370 in 1 : vector<4x16xf32>, vector<4x32xf32>, vector<4x32xf32> -> vector<4x80xf32>
    %cst_103 = arith.constant dense<0.000000e+00> : vector<4x96xf32>
    %374 = tpu.matmul %373, %256, %cst_103 {dimension_numbers = #tpu.dot_dimension_numbers<[1], [0], [0], [1], [0, 0, 1, 1], [], []>} : vector<4x80xf32>, vector<80x96xf32>, vector<4x96xf32> -> vector<4x96xf32>
    %375 = vector.broadcast %258 : vector<1x96xf32> to vector<4x96xf32>
    %376 = arith.addf %374, %375 : vector<4x96xf32>
    %cst_104 = arith.constant dense<0.000000e+00> : vector<4x96xf32>
    %377 = tpu.matmul %325, %257, %cst_104 {dimension_numbers = #tpu.dot_dimension_numbers<[1], [0], [0], [1], [0, 0, 1, 1], [], []>} : vector<4x32xf32>, vector<32x96xf32>, vector<4x96xf32> -> vector<4x96xf32>
    %378 = vector.broadcast %259 : vector<1x96xf32> to vector<4x96xf32>
    %379 = arith.addf %377, %378 : vector<4x96xf32>
    %380 = vector.extract_strided_slice %376 {offsets = [0, 0], sizes = [4, 32], strides = [1, 1]} : vector<4x96xf32> to vector<4x32xf32>
    %381 = vector.extract_strided_slice %379 {offsets = [0, 0], sizes = [4, 32], strides = [1, 1]} : vector<4x96xf32> to vector<4x32xf32>
    %382 = arith.addf %380, %381 : vector<4x32xf32>
    %383 = arith.negf %382 : vector<4x32xf32>
    %384 = math.exp %383 : vector<4x32xf32>
    %cst_105 = arith.constant 1.000000e+00 : f32
    %385 = vector.broadcast %cst_105 : f32 to vector<4x32xf32>
    %386 = arith.addf %385, %384 : vector<4x32xf32>
    %387 = arith.divf %385, %386 : vector<4x32xf32>
    %388 = vector.extract_strided_slice %376 {offsets = [0, 32], sizes = [4, 32], strides = [1, 1]} : vector<4x96xf32> to vector<4x32xf32>
    %389 = vector.extract_strided_slice %379 {offsets = [0, 32], sizes = [4, 32], strides = [1, 1]} : vector<4x96xf32> to vector<4x32xf32>
    %390 = arith.addf %388, %389 : vector<4x32xf32>
    %391 = arith.negf %390 : vector<4x32xf32>
    %392 = math.exp %391 : vector<4x32xf32>
    %cst_106 = arith.constant 1.000000e+00 : f32
    %393 = vector.broadcast %cst_106 : f32 to vector<4x32xf32>
    %394 = arith.addf %393, %392 : vector<4x32xf32>
    %395 = arith.divf %393, %394 : vector<4x32xf32>
    %396 = vector.extract_strided_slice %376 {offsets = [0, 64], sizes = [4, 32], strides = [1, 1]} : vector<4x96xf32> to vector<4x32xf32>
    %397 = vector.extract_strided_slice %379 {offsets = [0, 64], sizes = [4, 32], strides = [1, 1]} : vector<4x96xf32> to vector<4x32xf32>
    %398 = arith.mulf %387, %397 : vector<4x32xf32>
    %399 = arith.addf %396, %398 : vector<4x32xf32>
    %400 = math.tanh %399 : vector<4x32xf32>
    %cst_107 = arith.constant 1.000000e+00 : f32
    %401 = vector.broadcast %cst_107 : f32 to vector<4x32xf32>
    %402 = arith.subf %401, %395 : vector<4x32xf32>
    %403 = arith.mulf %402, %400 : vector<4x32xf32>
    %404 = arith.mulf %395, %325 : vector<4x32xf32>
    %405 = arith.addf %403, %404 : vector<4x32xf32>
    %cst_108 = arith.constant dense<0.000000e+00> : vector<4x32xf32>
    %406 = tpu.matmul %405, %260, %cst_108 {dimension_numbers = #tpu.dot_dimension_numbers<[1], [0], [0], [1], [0, 0, 1, 1], [], []>} : vector<4x32xf32>, vector<32x32xf32>, vector<4x32xf32> -> vector<4x32xf32>
    %407 = vector.broadcast %261 : vector<1x32xf32> to vector<4x32xf32>
    %408 = arith.addf %406, %407 : vector<4x32xf32>
    %cst_109 = arith.constant dense<0xFF800000> : vector<4xf32>
    %409 = vector.multi_reduction <maximumf>, %408, %cst_109 [1] : vector<4x32xf32> to vector<4xf32>
    %410 = vector.shape_cast %409 : vector<4xf32> to vector<4x1xf32>
    %411 = vector.broadcast %410 : vector<4x1xf32> to vector<4x32xf32>
    %412 = arith.subf %408, %411 : vector<4x32xf32>
    %413 = math.exp %412 : vector<4x32xf32>
    %cst_110 = arith.constant dense<0.000000e+00> : vector<4xf32>
    %414 = vector.multi_reduction <add>, %413, %cst_110 [1] : vector<4x32xf32> to vector<4xf32>
    %415 = vector.shape_cast %414 : vector<4xf32> to vector<4x1xf32>
    %416 = math.log %415 : vector<4x1xf32>
    %417 = vector.broadcast %416 : vector<4x1xf32> to vector<4x32xf32>
    %418 = arith.subf %412, %417 : vector<4x32xf32>
    %c1_111 = arith.constant 1 : index
    %c0_112 = arith.constant 0 : index
    %c0_113 = arith.constant 0 : index
    %419 = vector.load %arg19[%c1_111, %c0_112, %c0_113] : memref<3x4x32xf32, #tpu.memory_space<vmem>>, vector<1x4x32xf32>
    %420 = vector.shape_cast %419 : vector<1x4x32xf32> to vector<4x32xf32>
    %421 = vector.shape_cast %418 : vector<4x32xf32> to vector<1x4x32xf32>
    tpu.vector_store %arg19[%c1_111, %c0_112, %c0_113], %421 {strides = array<i32>} : memref<3x4x32xf32, #tpu.memory_space<vmem>>, vector<1x4x32xf32>,
    %cst_114 = arith.constant dense<0.000000e+00> : vector<4x32xf32>
    %422 = tpu.matmul %405, %254, %cst_114 {dimension_numbers = #tpu.dot_dimension_numbers<[1], [0], [0], [1], [0, 0, 1, 1], [], []>} : vector<4x32xf32>, vector<32x32xf32>, vector<4x32xf32> -> vector<4x32xf32>
    %423 = tpu.concatenate %422, %422, %422 in 0 : vector<4x32xf32>, vector<4x32xf32>, vector<4x32xf32> -> vector<12x32xf32>
    %424 = arith.addf %423, %253 : vector<12x32xf32>
    %425 = math.tanh %424 : vector<12x32xf32>
    %cst_115 = arith.constant dense<0.000000e+00> : vector<12x1xf32>
    %426 = tpu.matmul %425, %255, %cst_115 {dimension_numbers = #tpu.dot_dimension_numbers<[1], [0], [0], [1], [0, 0, 1, 1], [], []>} : vector<12x32xf32>, vector<32x1xf32>, vector<12x1xf32> -> vector<12x1xf32>
    %cst_116 = arith.constant -1.000000e+05 : f32
    %427 = vector.broadcast %cst_116 : f32 to vector<12x1xf32>
    %428 = arith.select %218, %427, %426 : vector<12x1xi1>, vector<12x1xf32>
    %429 = vector.extract_strided_slice %428 {offsets = [0, 0], sizes = [4, 1], strides = [1, 1]} : vector<12x1xf32> to vector<4x1xf32>
    %430 = vector.extract_strided_slice %428 {offsets = [4, 0], sizes = [4, 1], strides = [1, 1]} : vector<12x1xf32> to vector<4x1xf32>
    %431 = arith.maximumf %429, %430 : vector<4x1xf32>
    %432 = vector.extract_strided_slice %428 {offsets = [8, 0], sizes = [4, 1], strides = [1, 1]} : vector<12x1xf32> to vector<4x1xf32>
    %433 = arith.maximumf %431, %432 : vector<4x1xf32>
    %434 = tpu.concatenate %433, %433, %433 in 0 : vector<4x1xf32>, vector<4x1xf32>, vector<4x1xf32> -> vector<12x1xf32>
    %435 = arith.subf %428, %434 : vector<12x1xf32>
    %436 = math.exp %435 : vector<12x1xf32>
    %437 = vector.extract_strided_slice %436 {offsets = [0, 0], sizes = [4, 1], strides = [1, 1]} : vector<12x1xf32> to vector<4x1xf32>
    %438 = vector.extract_strided_slice %436 {offsets = [4, 0], sizes = [4, 1], strides = [1, 1]} : vector<12x1xf32> to vector<4x1xf32>
    %439 = arith.addf %437, %438 : vector<4x1xf32>
    %440 = vector.extract_strided_slice %436 {offsets = [8, 0], sizes = [4, 1], strides = [1, 1]} : vector<12x1xf32> to vector<4x1xf32>
    %441 = arith.addf %439, %440 : vector<4x1xf32>
    %442 = tpu.concatenate %441, %441, %441 in 0 : vector<4x1xf32>, vector<4x1xf32>, vector<4x1xf32> -> vector<12x1xf32>
    %443 = arith.divf %436, %442 : vector<12x1xf32>
    %444 = vector.broadcast %443 : vector<12x1xf32> to vector<12x32xf32>
    %445 = arith.mulf %444, %214 : vector<12x32xf32>
    %446 = vector.extract_strided_slice %445 {offsets = [0, 0], sizes = [4, 32], strides = [1, 1]} : vector<12x32xf32> to vector<4x32xf32>
    %447 = vector.extract_strided_slice %445 {offsets = [4, 0], sizes = [4, 32], strides = [1, 1]} : vector<12x32xf32> to vector<4x32xf32>
    %448 = arith.addf %446, %447 : vector<4x32xf32>
    %449 = vector.extract_strided_slice %445 {offsets = [8, 0], sizes = [4, 32], strides = [1, 1]} : vector<12x32xf32> to vector<4x32xf32>
    %450 = arith.addf %448, %449 : vector<4x32xf32>
    %c2 = arith.constant 2 : index
    %c0_117 = arith.constant 0 : index
    %c0_118 = arith.constant 0 : index
    %451 = vector.load %arg12[%c2, %c0_117, %c0_118] : memref<3x4x16xf32, #tpu.memory_space<vmem>>, vector<1x4x16xf32>
    %452 = vector.shape_cast %451 : vector<1x4x16xf32> to vector<4x16xf32>
    %453 = tpu.concatenate %452, %251, %450 in 1 : vector<4x16xf32>, vector<4x32xf32>, vector<4x32xf32> -> vector<4x80xf32>
    %cst_119 = arith.constant dense<0.000000e+00> : vector<4x96xf32>
    %454 = tpu.matmul %453, %256, %cst_119 {dimension_numbers = #tpu.dot_dimension_numbers<[1], [0], [0], [1], [0, 0, 1, 1], [], []>} : vector<4x80xf32>, vector<80x96xf32>, vector<4x96xf32> -> vector<4x96xf32>
    %455 = vector.broadcast %258 : vector<1x96xf32> to vector<4x96xf32>
    %456 = arith.addf %454, %455 : vector<4x96xf32>
    %cst_120 = arith.constant dense<0.000000e+00> : vector<4x96xf32>
    %457 = tpu.matmul %405, %257, %cst_120 {dimension_numbers = #tpu.dot_dimension_numbers<[1], [0], [0], [1], [0, 0, 1, 1], [], []>} : vector<4x32xf32>, vector<32x96xf32>, vector<4x96xf32> -> vector<4x96xf32>
    %458 = vector.broadcast %259 : vector<1x96xf32> to vector<4x96xf32>
    %459 = arith.addf %457, %458 : vector<4x96xf32>
    %460 = vector.extract_strided_slice %456 {offsets = [0, 0], sizes = [4, 32], strides = [1, 1]} : vector<4x96xf32> to vector<4x32xf32>
    %461 = vector.extract_strided_slice %459 {offsets = [0, 0], sizes = [4, 32], strides = [1, 1]} : vector<4x96xf32> to vector<4x32xf32>
    %462 = arith.addf %460, %461 : vector<4x32xf32>
    %463 = arith.negf %462 : vector<4x32xf32>
    %464 = math.exp %463 : vector<4x32xf32>
    %cst_121 = arith.constant 1.000000e+00 : f32
    %465 = vector.broadcast %cst_121 : f32 to vector<4x32xf32>
    %466 = arith.addf %465, %464 : vector<4x32xf32>
    %467 = arith.divf %465, %466 : vector<4x32xf32>
    %468 = vector.extract_strided_slice %456 {offsets = [0, 32], sizes = [4, 32], strides = [1, 1]} : vector<4x96xf32> to vector<4x32xf32>
    %469 = vector.extract_strided_slice %459 {offsets = [0, 32], sizes = [4, 32], strides = [1, 1]} : vector<4x96xf32> to vector<4x32xf32>
    %470 = arith.addf %468, %469 : vector<4x32xf32>
    %471 = arith.negf %470 : vector<4x32xf32>
    %472 = math.exp %471 : vector<4x32xf32>
    %cst_122 = arith.constant 1.000000e+00 : f32
    %473 = vector.broadcast %cst_122 : f32 to vector<4x32xf32>
    %474 = arith.addf %473, %472 : vector<4x32xf32>
    %475 = arith.divf %473, %474 : vector<4x32xf32>
    %476 = vector.extract_strided_slice %456 {offsets = [0, 64], sizes = [4, 32], strides = [1, 1]} : vector<4x96xf32> to vector<4x32xf32>
    %477 = vector.extract_strided_slice %459 {offsets = [0, 64], sizes = [4, 32], strides = [1, 1]} : vector<4x96xf32> to vector<4x32xf32>
    %478 = arith.mulf %467, %477 : vector<4x32xf32>
    %479 = arith.addf %476, %478 : vector<4x32xf32>
    %480 = math.tanh %479 : vector<4x32xf32>
    %cst_123 = arith.constant 1.000000e+00 : f32
    %481 = vector.broadcast %cst_123 : f32 to vector<4x32xf32>
    %482 = arith.subf %481, %475 : vector<4x32xf32>
    %483 = arith.mulf %482, %480 : vector<4x32xf32>
    %484 = arith.mulf %475, %405 : vector<4x32xf32>
    %485 = arith.addf %483, %484 : vector<4x32xf32>
    %cst_124 = arith.constant dense<0.000000e+00> : vector<4x32xf32>
    %486 = tpu.matmul %485, %260, %cst_124 {dimension_numbers = #tpu.dot_dimension_numbers<[1], [0], [0], [1], [0, 0, 1, 1], [], []>} : vector<4x32xf32>, vector<32x32xf32>, vector<4x32xf32> -> vector<4x32xf32>
    %487 = vector.broadcast %261 : vector<1x32xf32> to vector<4x32xf32>
    %488 = arith.addf %486, %487 : vector<4x32xf32>
    %cst_125 = arith.constant dense<0xFF800000> : vector<4xf32>
    %489 = vector.multi_reduction <maximumf>, %488, %cst_125 [1] : vector<4x32xf32> to vector<4xf32>
    %490 = vector.shape_cast %489 : vector<4xf32> to vector<4x1xf32>
    %491 = vector.broadcast %490 : vector<4x1xf32> to vector<4x32xf32>
    %492 = arith.subf %488, %491 : vector<4x32xf32>
    %493 = math.exp %492 : vector<4x32xf32>
    %cst_126 = arith.constant dense<0.000000e+00> : vector<4xf32>
    %494 = vector.multi_reduction <add>, %493, %cst_126 [1] : vector<4x32xf32> to vector<4xf32>
    %495 = vector.shape_cast %494 : vector<4xf32> to vector<4x1xf32>
    %496 = math.log %495 : vector<4x1xf32>
    %497 = vector.broadcast %496 : vector<4x1xf32> to vector<4x32xf32>
    %498 = arith.subf %492, %497 : vector<4x32xf32>
    %c2_127 = arith.constant 2 : index
    %c0_128 = arith.constant 0 : index
    %c0_129 = arith.constant 0 : index
    %499 = vector.load %arg19[%c2_127, %c0_128, %c0_129] : memref<3x4x32xf32, #tpu.memory_space<vmem>>, vector<1x4x32xf32>
    %500 = vector.shape_cast %499 : vector<1x4x32xf32> to vector<4x32xf32>
    %501 = vector.shape_cast %498 : vector<4x32xf32> to vector<1x4x32xf32>
    tpu.vector_store %arg19[%c2_127, %c0_128, %c0_129], %501 {strides = array<i32>} : memref<3x4x32xf32, #tpu.memory_space<vmem>>, vector<1x4x32xf32>,
    %c0_130 = arith.constant 0 : index
    %c0_131 = arith.constant 0 : index
    %502 = vector.load %arg20[%c0_130, %c0_131] : memref<4x32xf32, #tpu.memory_space<vmem>>, vector<4x32xf32>
    tpu.vector_store %arg20[%c0_130, %c0_131], %485 {strides = array<i32>} : memref<4x32xf32, #tpu.memory_space<vmem>>, vector<4x32xf32>,
    return
  }
}

</mosaic_0001>

<bundles_post_ra>
// kernel: seq2seq_forward.1
= control target key start
LH: loop header
LB: loop body
LE: loop exit
PB: predicated region body
PF: predicated region fallthrough
CT: control target
= control target key end

     0   :  { %s5129_s0 = inlined_call_operand.vmem [shape: f32[6,12,32], index: 0, kind: input, shape index: {}]   ;;  %s5130_s1 = inlined_call_operand.vmem [shape: f32[32,96], index: 1, kind: input, shape index: {}]   ;;  %s5131_s2 = inlined_call_operand.vmem [shape: f32[32,96], index: 2, kind: input, shape index: {}]   ;;  %s5132_s3 = inlined_call_operand.vmem [shape: f32[1,96], index: 3, kind: input, shape index: {}]   ;;  %s5133_s4 = inlined_call_operand.vmem [shape: f32[1,96], index: 4, kind: input, shape index: {}]   ;;  %s5134_s5 = inlined_call_operand.vmem [shape: f32[12,1], index: 5, kind: input, shape index: {}]   ;;  %s5135_s6 = inlined_call_operand.vmem [shape: f32[32,32], index: 6, kind: input, shape index: {}]   ;;  %s5136_s7 = inlined_call_operand.vmem [shape: f32[32,32], index: 7, kind: input, shape index: {}]   ;;  %s5137_s8 = inlined_call_operand.vmem [shape: f32[32,1], index: 8, kind: input, shape index: {}]   ;;  %s5138_s9 = inlined_call_operand.vmem [shape: f32[32,32], index: 9, kind: input, shape index: {}]   ;;  %s5139_s10 = inlined_call_operand.vmem [shape: f32[32,32], index: 10, kind: input, shape index: {}]   ;;  %s5140_s11 = inlined_call_operand.vmem [shape: f32[32,1], index: 11, kind: input, shape index: {}]   ;;  %s5141_s12 = inlined_call_operand.vmem [shape: f32[3,4,16], index: 12, kind: input, shape index: {}]   ;;  %s5142_s13 = inlined_call_operand.vmem [shape: f32[80,96], index: 13, kind: input, shape index: {}]   ;;  %s5143_s14 = inlined_call_operand.vmem [shape: f32[32,96], index: 14, kind: input, shape index: {}]   ;;  %s5144_s15 = inlined_call_operand.vmem [shape: f32[1,96], index: 15, kind: input, shape index: {}]   ;;  %s5145_s16 = inlined_call_operand.vmem [shape: f32[1,96], index: 16, kind: input, shape index: {}]   ;;  %s5146_s17 = inlined_call_operand.vmem [shape: f32[32,32], index: 17, kind: input, shape index: {}]   ;;  %s5147_s18 = inlined_call_operand.vmem [shape: f32[1,32], index: 18, kind: input, shape index: {}]   ;;  %s5148_s19 = inlined_call_operand.hbm [shape: f32[3,4,32], index: 19, kind: output, shape index: {0}]   ;;  %s5149_s20 = inlined_call_operand.hbm [shape: f32[4,32], index: 20, kind: output, shape index: {1}]  }
   0x1   :  { %5153 = sst [smem:[#allocation8_spill]] %s5129_s0 }
   0x2   :  { %5154 = sst [smem:[#allocation9_spill]] %s5130_s1 }
   0x3   :  { %5155 = sst [smem:[#allocation10_spill]] %s5131_s2 }
   0x4   :  { %5156 = sst [smem:[#allocation11_spill]] %s5132_s3 }
   0x5   :  { %5157 = sst [smem:[#allocation12_spill]] %s5133_s4 }
   0x6   :  { %26 = vsyncpa [#allocation3], 0  ;;  %s5158_s23 = sld [smem:[#allocation9_spill]] }
   0x7   :  { %s5159_s25 = sld [smem:[#allocation10_spill]] }
   0xc   :  { %v4266_v0 = vld [vmem:[%s5158_s23 + $0x18] sm:$0xff]  ;;  %v4276_v2 = vld [vmem:[%s5158_s23 + $0x10] sm:$0xff]  ;;  %v4290_v4 = vld [vmem:[%s5158_s23 + $0x8] sm:$0xff] }
   0xd   :  { %v4271_v1 = vld [vmem:[%s5159_s25 + $0x18] sm:$0xff]  ;;  %3565 = vmatprep.subr.mxu0 %v4266_v0  ;;  %v4283_v3 = vld [vmem:[%s5159_s25 + $0x10] sm:$0xff]  ;;  %v4295_v5 = vld [vmem:[%s5159_s25 + $0x8] sm:$0xff] }
   0xe   :  { %3576 = vmatprep.subr.mxu1 %v4271_v1  ;;  %3566 = vmatpush3.msra.mxu0 %v4266_v0 }
   0xf   :  { %3577 = vmatpush3.msra.mxu1 %v4271_v1  ;;  %3567 = vmatprep.subr.mxu0 %v4276_v2 }
  0x10   :  { %3578 = vmatprep.subr.mxu1 %v4283_v3 }
  0x11   :  { %27 = vsyncpa [#allocation5], 0  ;;  %3568 = vmatpush3.msra.mxu0 %v4276_v2  ;;  %3579 = vmatpush3.msra.mxu1 %v4283_v3  ;;  %v4304_v6 = vld [vmem:[%s5158_s23] sm:$0xff]  ;;  %s5160_s26 = sld [smem:[#allocation8_spill]]  ;;  %vm84_vm0 = vcmask 261120   ;;  %v4148_v10 = vmov 0.0  }
  0x12   :  { %v4309_v7 = vld [vmem:[%s5159_s25] sm:$0xff]  ;;  %3569 = vmatprep.subr.mxu0 %v4290_v4  ;;  %3580 = vmatprep.subr.mxu1 %v4295_v5  ;;  %s5161_s4 = sld [smem:[#allocation12_spill]]  ;;  %s4149_s29 = smov 64   ;;  %vm4151_vm1 = vmmov 0   ;;  %vm1581_vm2 = vcmask 1043456   ;;  %vm2038_vm5 = vcmask 130048  }
  0x13   :  { %3570 = vmatpush3.msra.mxu0 %v4290_v4  ;;  %3581 = vmatpush3.msra.mxu1 %v4295_v5  ;;  %s5162_s21 = sld [smem:[#allocation11_spill]]  ;;  %s4150_s1 = smov 96   ;;  %vm2040_vm6 = vcmask 392192   ;;  %vm2048_vm7 = vcmask 654336   ;;  %vm2305_vm8 = vcmask 257024  }
  0x14   :  { %3571 = vmatprep.subr.mxu0 %v4304_v6  ;;  %3582 = vmatprep.subr.mxu1 %v4309_v7  ;;  %s4154_s3 = smov 16  }
  0x15   :  { %3572 = vmatpush3.msra.mxu0 %v4304_v6  ;;  %3583 = vmatpush3.msra.mxu1 %v4309_v7 }
  0x16   :  { %3584 = vmatprep.mubr.f32.mxu1 %v4148_v10  ;;  %3587 = vmatprep.subr.mxu0 %v4266_v0 }
  0x17   :  { %v76_v8 = vld [vmem:[%s5160_s26] sm:$0xff]  ;;  %v77_v9 = vld [vmem:[%s5160_s26 + $0x8] sm:$0xf]  ;;  %3585 = vmatmul.mubr.f32.vlgmr.msra.gmra.mxu1 %v4148_v10  ;;  %3598 = vmatprep.subr.mxu1 %v4271_v1  ;;  %v3301_v41 = vld [vmem:[%s5160_s26 + $0x10] sm:$0xff] }
  0x18   :  { %3573 = vmatprep.mubr.msk.f32.mxu0 %vm84_vm0, %v76_v8  ;;  %3599 = vmatpush3.msra.mxu1 %v4271_v1  ;;  %v4350_v12 = vld [vmem:[%s5161_s4] ss:$0 sm:$0xff]  ;;  %v3302_v42 = vld [vmem:[%s5160_s26 + $0x18] sm:$0xf] }
  0x19   :  { %3574 = vmatmul.mubr.msk.f32.vlgmr.msra.gmra.mxu0 %vm84_vm0, %v77_v9  ;;  %3600 = vmatprep.subr.mxu1 %v4283_v3  ;;  %v4359_v18 = vld [vmem:[%s5162_s21] ss:$0 sm:$0xff] }
  0x1a   :  { %3588 = vmatpush3.msra.mxu0 %v4266_v0  ;;  %3601 = vmatpush3.msra.mxu1 %v4283_v3 }
  0x1b   :  { %3589 = vmatprep.subr.mxu0 %v4276_v2  ;;  %3602 = vmatprep.subr.mxu1 %v4295_v5 }
  0x1c   :  { %3590 = vmatpush3.msra.mxu0 %v4276_v2  ;;  %3603 = vmatpush3.msra.mxu1 %v4295_v5 }
  0x1d   :  { %3591 = vmatprep.subr.mxu0 %v4290_v4  ;;  %3604 = vmatprep.subr.mxu1 %v4309_v7 }
  0x1e   :  { %3592 = vmatpush3.msra.mxu0 %v4290_v4  ;;  %3605 = vmatpush3.msra.mxu1 %v4309_v7 }
  0x1f   :  { %3593 = vmatprep.subr.mxu0 %v4304_v6  ;;  %3620 = vmatprep.subr.mxu1 %v4271_v1 }
  0x20   :  { %3594 = vmatpush3.msra.mxu0 %v4304_v6  ;;  %3595 = vmatprep.mubr.msk.f32.mxu0 %vm84_vm0, %v3301_v41 }
  0x21   :  { %3609 = vmatprep.subr.mxu0 %v4266_v0  ;;  %3596 = vmatmul.mubr.msk.f32.vlgmr.msra.gmra.mxu0 %vm84_vm0, %v3302_v42 }
  0x22   :  { %3610 = vmatpush3.msra.mxu0 %v4266_v0 }
  0x23   :  { %3611 = vmatprep.subr.mxu0 %v4276_v2 }
  0x24   :  { %3612 = vmatpush3.msra.mxu0 %v4276_v2 }
  0x25   :  { %3613 = vmatprep.subr.mxu0 %v4290_v4 }
  0x26   :  { %3614 = vmatpush3.msra.mxu0 %v4290_v4 }
  0x27   :  { %3615 = vmatprep.subr.mxu0 %v4304_v6 }
  0x28   :  { %3616 = vmatpush3.msra.mxu0 %v4304_v6 }
  0x29   :  { %3631 = vmatprep.subr.mxu0 %v4266_v0 }
  0xd7   :  { %v3586_v11 = vpop.f32.mrf.mxu1 }
  0xd8   :  { %v247_v15 = vadd.f32 %v3586_v11, %v4350_v12 }
  0xd9   :  { %v241_v13 = vpop.f32.mrf.mxu1  ;;  %v3575_v16 = vpop.f32.mrf.mxu0 }
  0xda   :  { %v242_v14 = vadd.f32 %v4350_v12, %v241_v13  ;;  %v163_v20 = vadd.f32 %v3575_v16, %v4359_v18 }
  0xdb   :  { %v157_v17 = vpop.f32.mrf.mxu0 }
  0xdc   :  { %266 = vrot.lane.b32.xlu0 %v242_v14, %s4149_s29  ;;  %v158_v19 = vadd.f32 %v4359_v18, %v157_v17  ;;  %v251_v22 = vadd.f32 %v247_v15, %v163_v20 }
  0xde   :  { %v250_v21 = vadd.f32 %v242_v14, %v158_v19  ;;  %v3300_v24 = vmul.f32 -1.442695, %v251_v22 }
  0xe0   :  { %268 = vrot.lane.b32.xlu0 %v247_v15, %s4149_s29  ;;  %v3299_v23 = vmul.f32 -1.442695, %v250_v21 }
  0xe1   :  { %v3597_v59 = vpop.f32.mrf.mxu0 }
  0xe2   :  { %3954 = vpow2.f32 %v3299_v23  ;;  %v383_v61 = vadd.f32 %v3597_v59, %v4359_v18 }
  0xe3   :  { %3956 = vpow2.f32 %v3300_v24  ;;  %v377_v60 = vpop.f32.mrf.mxu0 }
  0xe4   :  { %v378_v62 = vadd.f32 %v4359_v18, %v377_v60 }
  0xef   :  { %v3955_v25 = vpop.eup %3954 }
  0xf0   :  { %v258_v26 = vadd.f32 1.0, %v3955_v25  ;;  %v3957_v27 = vpop.eup %3956 }
  0xf1   :  { %v259_v28 = vadd.f32 1.0, %v3957_v27 }
  0xf2   :  { %3958 = vrcp.f32 %v258_v26 }
  0xf3   :  { %3960 = vrcp.f32 %v259_v28 }
  0xff   :  { %v3959_v29 = vpop.eup %3958 }
 0x100   :  { %v3961_v32 = vpop.eup %3960  ;;  %v286_v43 = vsub.f32 1.0, %v3959_v29  ;;  %v298_v45 = vmul.f32 0.0, %v3959_v29 }
 0x101   :  { %v287_v48 = vsub.f32 1.0, %v3961_v32  ;;  %v299_v50 = vmul.f32 0.0, %v3961_v32 }
 0x14e   :  { %v267_v30 = vpop.permute.xlu0 %266 }
 0x14f   :  { %v272_v31 = vmul.f32 %v3959_v29, %v267_v30  ;;  %v3309_v30 = vld [vmem:[%s5160_s26 + $0x20] sm:$0xff] }
 0x150   :  { %3617 = vmatprep.mubr.msk.f32.mxu0 %vm84_vm0, %v3309_v30 }
 0x151   :  { %276 = vrot.lane.b32.xlu1 %v272_v31, %s4149_s29  ;;  %v3310_v31 = vld [vmem:[%s5160_s26 + $0x28] sm:$0xf] }
 0x152   :  { %v269_v33 = vpop.permute.xlu0 %268  ;;  %3618 = vmatmul.mubr.msk.f32.vlgmr.msra.gmra.mxu0 %vm84_vm0, %v3310_v31 }
 0x153   :  { %v273_v34 = vmul.f32 %v3961_v32, %v269_v33  ;;  %3632 = vmatpush3.msra.mxu0 %v4266_v0 }
 0x154   :  { %3633 = vmatprep.subr.mxu0 %v4276_v2 }
 0x155   :  { %278 = vrot.lane.b32.xlu1 %v273_v34, %s4149_s29  ;;  %3634 = vmatpush3.msra.mxu0 %v4276_v2 }
 0x156   :  { %3635 = vmatprep.subr.mxu0 %v4290_v4 }
 0x157   :  { %3636 = vmatpush3.msra.mxu0 %v4290_v4 }
 0x158   :  { %3637 = vmatprep.subr.mxu0 %v4304_v6 }
 0x159   :  { %3638 = vmatpush3.msra.mxu0 %v4304_v6 }
 0x15a   :  { %3653 = vmatprep.subr.mxu0 %v4266_v0 }
 0x1c3   :  { %v277_v35 = vpop.permute.xlu1 %276 }
 0x1c4   :  { %v282_v36 = vadd.f32 %v277_v35, %v158_v19 }
 0x1c6   :  { %3962 = vtanh.f32 %v282_v36 }
 0x1c7   :  { %v279_v37 = vpop.permute.xlu1 %278 }
 0x1c8   :  { %v283_v38 = vadd.f32 %v279_v37, %v163_v20 }
 0x1ca   :  { %3964 = vtanh.f32 %v283_v38 }
 0x1d3   :  { %v3963_v39 = vpop.eup %3962 }
 0x1d4   :  { %290 = vrot.lane.b32.xlu0 %v3963_v39, %s4150_s1 }
 0x1d7   :  { %v3965_v40 = vpop.eup %3964 }
 0x1d8   :  { %292 = vrot.lane.b32.xlu1 %v3965_v40, %s4150_s1 }
 0x246   :  { %v291_v44 = vpop.permute.xlu0 %290 }
 0x247   :  { %v296_v46 = vmul.f32 %v291_v44, %v286_v43 }
 0x249   :  { %v4381_v47 = vadd.f32 %v298_v45, %v296_v46 }
 0x24a   :  { %v293_v49 = vpop.permute.xlu1 %292 }
 0x24b   :  { %v297_v51 = vmul.f32 %v293_v49, %v287_v48  ;;  %388 = vrot.lane.b32.xlu0 %v4381_v47, %s4150_s1  ;;  %v3619_v48 = vpop.f32.mrf.mxu0 }
 0x24d   :  { %v4387_v52 = vadd.f32 %v299_v50, %v297_v51  ;;  %v598_v49 = vpop.f32.mrf.mxu0  ;;  %v604_v50 = vadd.f32 %v3619_v48, %v4359_v18 }
 0x24e   :  { %v599_v51 = vadd.f32 %v4359_v18, %v598_v49 }
 0x24f   :  { %390 = vrot.lane.b32.xlu1 %v4387_v52, %s4150_s1 }
 0x2bd   :  { %v389_v53 = vpop.permute.xlu0 %388 }
 0x2be   :  { %3606 = vmatprep.mubr.msk.f32.mxu1 %vm84_vm0, %v389_v53 }
 0x2c1   :  { %v391_v54 = vpop.permute.xlu1 %390 }
 0x2c2   :  { %3607 = vmatmul.mubr.msk.f32.vlgmr.msra.gmra.mxu1 %vm84_vm0, %v391_v54 }
 0x2c3   :  { %3621 = vmatpush3.msra.mxu1 %v4271_v1 }
 0x2c4   :  { %3622 = vmatprep.subr.mxu1 %v4283_v3 }
 0x2c5   :  { %3623 = vmatpush3.msra.mxu1 %v4283_v3 }
 0x2c6   :  { %3624 = vmatprep.subr.mxu1 %v4295_v5 }
 0x2c7   :  { %3625 = vmatpush3.msra.mxu1 %v4295_v5 }
 0x2c8   :  { %3626 = vmatprep.subr.mxu1 %v4309_v7 }
 0x2c9   :  { %3627 = vmatpush3.msra.mxu1 %v4309_v7 }
 0x2ca   :  { %3642 = vmatprep.subr.mxu1 %v4271_v1 }
 0x382   :  { %v3608_v55 = vpop.f32.mrf.mxu1 }
 0x383   :  { %v468_v56 = vadd.f32 %v3608_v55, %v4350_v12 }
 0x384   :  { %v462_v57 = vpop.f32.mrf.mxu1 }
 0x385   :  { %v463_v58 = vadd.f32 %v4350_v12, %v462_v57  ;;  %489 = vrot.lane.b32.xlu1 %v468_v56, %s4149_s29  ;;  %v472_v63 = vadd.f32 %v468_v56, %v383_v61 }
 0x387   :  { %487 = vrot.lane.b32.xlu0 %v463_v58, %s4149_s29  ;;  %v471_v8 = vadd.f32 %v463_v58, %v378_v62  ;;  %v3308_v9 = vmul.f32 -1.442695, %v472_v63 }
 0x389   :  { %v3307_v11 = vmul.f32 -1.442695, %v471_v8  ;;  %3966 = vpow2.f32 %v3308_v9 }
 0x38b   :  { %3968 = vpow2.f32 %v3307_v11 }
 0x396   :  { %v3967_v13 = vpop.eup %3966 }
 0x397   :  { %v480_v15 = vadd.f32 1.0, %v3967_v13 }
 0x398   :  { %v3969_v14 = vpop.eup %3968 }
 0x399   :  { %v479_v16 = vadd.f32 1.0, %v3969_v14  ;;  %3970 = vrcp.f32 %v480_v15 }
 0x39b   :  { %3972 = vrcp.f32 %v479_v16 }
 0x3a6   :  { %v3971_v17 = vpop.eup %3970 }
 0x3a7   :  { %v508_v32 = vsub.f32 1.0, %v3971_v17  ;;  %v520_v34 = vmul.f32 %v3971_v17, %v4387_v52 }
 0x3a8   :  { %v3973_v21 = vpop.eup %3972 }
 0x3a9   :  { %v507_v36 = vsub.f32 1.0, %v3973_v21  ;;  %v519_v39 = vmul.f32 %v3973_v21, %v4381_v47 }
 0x3f7   :  { %v490_v19 = vpop.permute.xlu1 %489 }
 0x3f8   :  { %v494_v20 = vmul.f32 %v3971_v17, %v490_v19  ;;  %v3317_v19 = vld [vmem:[%s5160_s26 + $0x30] sm:$0xff] }
 0x3f9   :  { %v488_v22 = vpop.permute.xlu0 %487  ;;  %3639 = vmatprep.mubr.msk.f32.mxu0 %vm84_vm0, %v3317_v19 }
 0x3fa   :  { %v493_v23 = vmul.f32 %v3973_v21, %v488_v22  ;;  %499 = vrot.lane.b32.xlu1 %v494_v20, %s4149_s29  ;;  %v3318_v20 = vld [vmem:[%s5160_s26 + $0x38] sm:$0xf] }
 0x3fb   :  { %3640 = vmatmul.mubr.msk.f32.vlgmr.msra.gmra.mxu0 %vm84_vm0, %v3318_v20 }
 0x3fc   :  { %497 = vrot.lane.b32.xlu0 %v493_v23, %s4149_s29  ;;  %3654 = vmatpush3.msra.mxu0 %v4266_v0 }
 0x3fd   :  { %3655 = vmatprep.subr.mxu0 %v4276_v2 }
 0x3fe   :  { %3656 = vmatpush3.msra.mxu0 %v4276_v2 }
 0x3ff   :  { %3657 = vmatprep.subr.mxu0 %v4290_v4 }
 0x400   :  { %3658 = vmatpush3.msra.mxu0 %v4290_v4 }
 0x401   :  { %3659 = vmatprep.subr.mxu0 %v4304_v6 }
 0x402   :  { %3660 = vmatpush3.msra.mxu0 %v4304_v6 }
 0x403   :  { %3675 = vmatprep.subr.mxu0 %v4266_v0 }
 0x46c   :  { %v500_v24 = vpop.permute.xlu1 %499 }
 0x46d   :  { %v504_v25 = vadd.f32 %v500_v24, %v383_v61 }
 0x46e   :  { %v498_v26 = vpop.permute.xlu0 %497 }
 0x46f   :  { %3974 = vtanh.f32 %v504_v25  ;;  %v503_v27 = vadd.f32 %v498_v26, %v378_v62 }
 0x471   :  { %3976 = vtanh.f32 %v503_v27 }
 0x47c   :  { %v3975_v28 = vpop.eup %3974 }
 0x47d   :  { %513 = vrot.lane.b32.xlu1 %v3975_v28, %s4150_s1 }
 0x47e   :  { %v3977_v29 = vpop.eup %3976 }
 0x47f   :  { %511 = vrot.lane.b32.xlu0 %v3977_v29, %s4150_s1 }
 0x4ef   :  { %v514_v33 = vpop.permute.xlu1 %513 }
 0x4f0   :  { %v518_v35 = vmul.f32 %v514_v33, %v508_v32 }
 0x4f1   :  { %v512_v37 = vpop.permute.xlu0 %511 }
 0x4f2   :  { %v4427_v38 = vadd.f32 %v520_v34, %v518_v35  ;;  %v517_v40 = vmul.f32 %v512_v37, %v507_v36  ;;  %v3641_v37 = vpop.f32.mrf.mxu0 }
 0x4f4   :  { %v4431_v41 = vadd.f32 %v519_v39, %v517_v40  ;;  %611 = vrot.lane.b32.xlu1 %v4427_v38, %s4150_s1  ;;  %v825_v39 = vadd.f32 %v3641_v37, %v4359_v18 }
 0x4f6   :  { %609 = vrot.lane.b32.xlu0 %v4431_v41, %s4150_s1 }
 0x566   :  { %v612_v43 = vpop.permute.xlu1 %611 }
 0x568   :  { %v610_v42 = vpop.permute.xlu0 %609 }
 0x569   :  { %3628 = vmatprep.mubr.msk.f32.mxu1 %vm84_vm0, %v610_v42 }
 0x56a   :  { %3629 = vmatmul.mubr.msk.f32.vlgmr.msra.gmra.mxu1 %vm84_vm0, %v612_v43 }
 0x56b   :  { %3643 = vmatpush3.msra.mxu1 %v4271_v1 }
 0x56c   :  { %3644 = vmatprep.subr.mxu1 %v4283_v3 }
 0x56d   :  { %3645 = vmatpush3.msra.mxu1 %v4283_v3 }
 0x56e   :  { %3646 = vmatprep.subr.mxu1 %v4295_v5 }
 0x56f   :  { %3647 = vmatpush3.msra.mxu1 %v4295_v5 }
 0x570   :  { %3648 = vmatprep.subr.mxu1 %v4309_v7 }
 0x571   :  { %3649 = vmatpush3.msra.mxu1 %v4309_v7 }
 0x572   :  { %3664 = vmatprep.subr.mxu1 %v4271_v1 }
 0x62a   :  { %v3630_v44 = vpop.f32.mrf.mxu1 }
 0x62b   :  { %v689_v45 = vadd.f32 %v3630_v44, %v4350_v12 }
 0x62c   :  { %v683_v46 = vpop.f32.mrf.mxu1 }
 0x62d   :  { %v684_v47 = vadd.f32 %v4350_v12, %v683_v46  ;;  %710 = vrot.lane.b32.xlu1 %v689_v45, %s4149_s29  ;;  %v693_v52 = vadd.f32 %v689_v45, %v604_v50 }
 0x62f   :  { %708 = vrot.lane.b32.xlu0 %v684_v47, %s4149_s29  ;;  %v692_v53 = vadd.f32 %v684_v47, %v599_v51  ;;  %v3316_v54 = vmul.f32 -1.442695, %v693_v52 }
 0x631   :  { %v3315_v55 = vmul.f32 -1.442695, %v692_v53  ;;  %3978 = vpow2.f32 %v3316_v54 }
 0x633   :  { %3980 = vpow2.f32 %v3315_v55 }
 0x63e   :  { %v3979_v56 = vpop.eup %3978 }
 0x63f   :  { %v701_v58 = vadd.f32 1.0, %v3979_v56 }
 0x640   :  { %v3981_v57 = vpop.eup %3980 }
 0x641   :  { %v700_v59 = vadd.f32 1.0, %v3981_v57  ;;  %3982 = vrcp.f32 %v701_v58 }
 0x643   :  { %3984 = vrcp.f32 %v700_v59 }
 0x64e   :  { %v3983_v60 = vpop.eup %3982 }
 0x64f   :  { %v729_v21 = vsub.f32 1.0, %v3983_v60  ;;  %v741_v23 = vmul.f32 %v3983_v60, %v4427_v38  ;;  %v819_v38 = vpop.f32.mrf.mxu0 }
 0x650   :  { %v3985_v63 = vpop.eup %3984  ;;  %v820_v40 = vadd.f32 %v4359_v18, %v819_v38 }
 0x651   :  { %v728_v25 = vsub.f32 1.0, %v3985_v63  ;;  %v740_v28 = vmul.f32 %v3985_v63, %v4431_v41 }
 0x69f   :  { %v711_v61 = vpop.permute.xlu1 %710 }
 0x6a0   :  { %v715_v62 = vmul.f32 %v3983_v60, %v711_v61  ;;  %v3325_v61 = vld [vmem:[%s5160_s26 + $0x40] sm:$0xff] }
 0x6a1   :  { %v709_v8 = vpop.permute.xlu0 %708  ;;  %3661 = vmatprep.mubr.msk.f32.mxu0 %vm84_vm0, %v3325_v61 }
 0x6a2   :  { %v714_v9 = vmul.f32 %v3985_v63, %v709_v8  ;;  %720 = vrot.lane.b32.xlu1 %v715_v62, %s4149_s29  ;;  %v3326_v62 = vld [vmem:[%s5160_s26 + $0x48] sm:$0xf] }
 0x6a3   :  { %3662 = vmatmul.mubr.msk.f32.vlgmr.msra.gmra.mxu0 %vm84_vm0, %v3326_v62 }
 0x6a4   :  { %718 = vrot.lane.b32.xlu0 %v714_v9, %s4149_s29  ;;  %3676 = vmatpush3.msra.mxu0 %v4266_v0 }
 0x6a5   :  { %3677 = vmatprep.subr.mxu0 %v4276_v2 }
 0x6a6   :  { %3678 = vmatpush3.msra.mxu0 %v4276_v2 }
 0x6a7   :  { %3679 = vmatprep.subr.mxu0 %v4290_v4 }
 0x6a8   :  { %3680 = vmatpush3.msra.mxu0 %v4290_v4 }
 0x6a9   :  { %3681 = vmatprep.subr.mxu0 %v4304_v6 }
 0x6aa   :  { %3682 = vmatpush3.msra.mxu0 %v4304_v6 }
 0x714   :  { %v721_v11 = vpop.permute.xlu1 %720 }
 0x715   :  { %v725_v13 = vadd.f32 %v721_v11, %v604_v50 }
 0x716   :  { %v719_v14 = vpop.permute.xlu0 %718 }
 0x717   :  { %3986 = vtanh.f32 %v725_v13  ;;  %v724_v15 = vadd.f32 %v719_v14, %v599_v51 }
 0x719   :  { %3988 = vtanh.f32 %v724_v15 }
 0x724   :  { %v3987_v16 = vpop.eup %3986 }
 0x725   :  { %734 = vrot.lane.b32.xlu1 %v3987_v16, %s4150_s1 }
 0x726   :  { %v3989_v17 = vpop.eup %3988 }
 0x727   :  { %732 = vrot.lane.b32.xlu0 %v3989_v17, %s4150_s1 }
 0x797   :  { %v735_v22 = vpop.permute.xlu1 %734 }
 0x798   :  { %v739_v24 = vmul.f32 %v735_v22, %v729_v21 }
 0x799   :  { %v733_v26 = vpop.permute.xlu0 %732 }
 0x79a   :  { %v4473_v27 = vadd.f32 %v741_v23, %v739_v24  ;;  %v738_v29 = vmul.f32 %v733_v26, %v728_v25 }
 0x79c   :  { %v4477_v30 = vadd.f32 %v740_v28, %v738_v29  ;;  %832 = vrot.lane.b32.xlu1 %v4473_v27, %s4150_s1 }
 0x79e   :  { %830 = vrot.lane.b32.xlu0 %v4477_v30, %s4150_s1 }
 0x80e   :  { %v833_v32 = vpop.permute.xlu1 %832 }
 0x810   :  { %v831_v31 = vpop.permute.xlu0 %830 }
 0x811   :  { %3650 = vmatprep.mubr.msk.f32.mxu1 %vm84_vm0, %v831_v31 }
 0x812   :  { %3651 = vmatmul.mubr.msk.f32.vlgmr.msra.gmra.mxu1 %vm84_vm0, %v833_v32 }
 0x813   :  { %3665 = vmatpush3.msra.mxu1 %v4271_v1 }
 0x814   :  { %3666 = vmatprep.subr.mxu1 %v4283_v3 }
 0x815   :  { %3667 = vmatpush3.msra.mxu1 %v4283_v3 }
 0x816   :  { %3668 = vmatprep.subr.mxu1 %v4295_v5 }
 0x817   :  { %3669 = vmatpush3.msra.mxu1 %v4295_v5 }
 0x818   :  { %3670 = vmatprep.subr.mxu1 %v4309_v7 }
 0x819   :  { %3671 = vmatpush3.msra.mxu1 %v4309_v7 }
 0x81a   :  { %3686 = vmatprep.subr.mxu1 %v4271_v1 }
 0x8d2   :  { %v3652_v33 = vpop.f32.mrf.mxu1 }
 0x8d3   :  { %v910_v34 = vadd.f32 %v3652_v33, %v4350_v12 }
 0x8d4   :  { %v904_v35 = vpop.f32.mrf.mxu1 }
 0x8d5   :  { %v905_v36 = vadd.f32 %v4350_v12, %v904_v35  ;;  %931 = vrot.lane.b32.xlu1 %v910_v34, %s4149_s29  ;;  %v914_v41 = vadd.f32 %v910_v34, %v825_v39 }
 0x8d7   :  { %929 = vrot.lane.b32.xlu0 %v905_v36, %s4149_s29  ;;  %v913_v42 = vadd.f32 %v905_v36, %v820_v40  ;;  %v3324_v43 = vmul.f32 -1.442695, %v914_v41 }
 0x8d9   :  { %v3323_v44 = vmul.f32 -1.442695, %v913_v42  ;;  %3990 = vpow2.f32 %v3324_v43  ;;  %v3333_v42 = vld [vmem:[%s5160_s26 + $0x50] sm:$0xff]  ;;  %v3334_v43 = vld [vmem:[%s5160_s26 + $0x58] sm:$0xf] }
 0x8da   :  { %3683 = vmatprep.mubr.msk.f32.mxu0 %vm84_vm0, %v3333_v42 }
 0x8db   :  { %3992 = vpow2.f32 %v3323_v44  ;;  %3684 = vmatmul.mubr.msk.f32.vlgmr.msra.gmra.mxu0 %vm84_vm0, %v3334_v43  ;;  %v1716_v43 = vld [vmem:[%s5139_s10 + $0x8] sm:$0xff] }
 0x8e6   :  { %v3991_v45 = vpop.eup %3990 }
 0x8e7   :  { %v922_v47 = vadd.f32 1.0, %v3991_v45 }
 0x8e8   :  { %v3993_v46 = vpop.eup %3992 }
 0x8e9   :  { %v921_v48 = vadd.f32 1.0, %v3993_v46  ;;  %3994 = vrcp.f32 %v922_v47 }
 0x8eb   :  { %3996 = vrcp.f32 %v921_v48 }
 0x8f6   :  { %v3995_v49 = vpop.eup %3994 }
 0x8f7   :  { %v950_v63 = vsub.f32 1.0, %v3995_v49  ;;  %v962_v9 = vmul.f32 %v3995_v49, %v4473_v27 }
 0x8f8   :  { %v3997_v52 = vpop.eup %3996 }
 0x8f9   :  { %v949_v13 = vsub.f32 1.0, %v3997_v52  ;;  %v961_v15 = vmul.f32 %v3997_v52, %v4477_v30 }
 0x947   :  { %v932_v50 = vpop.permute.xlu1 %931 }
 0x948   :  { %v936_v51 = vmul.f32 %v3995_v49, %v932_v50 }
 0x949   :  { %v930_v53 = vpop.permute.xlu0 %929 }
 0x94a   :  { %v935_v54 = vmul.f32 %v3997_v52, %v930_v53  ;;  %941 = vrot.lane.b32.xlu1 %v936_v51, %s4149_s29 }
 0x94c   :  { %939 = vrot.lane.b32.xlu0 %v935_v54, %s4149_s29 }
 0x9bc   :  { %v942_v55 = vpop.permute.xlu1 %941 }
 0x9bd   :  { %v946_v56 = vadd.f32 %v942_v55, %v825_v39 }
 0x9be   :  { %v940_v57 = vpop.permute.xlu0 %939 }
 0x9bf   :  { %3998 = vtanh.f32 %v946_v56  ;;  %v945_v58 = vadd.f32 %v940_v57, %v820_v40 }
 0x9c1   :  { %4000 = vtanh.f32 %v945_v58 }
 0x9cc   :  { %v3999_v59 = vpop.eup %3998 }
 0x9cd   :  { %955 = vrot.lane.b32.xlu1 %v3999_v59, %s4150_s1 }
 0x9ce   :  { %v4001_v60 = vpop.eup %4000 }
 0x9cf   :  { %953 = vrot.lane.b32.xlu0 %v4001_v60, %s4150_s1 }
 0xa3f   :  { %v956_v8 = vpop.permute.xlu1 %955 }
 0xa40   :  { %v960_v11 = vmul.f32 %v956_v8, %v950_v63 }
 0xa41   :  { %v954_v14 = vpop.permute.xlu0 %953 }
 0xa42   :  { %v4519_v0 = vadd.f32 %v962_v9, %v960_v11  ;;  %v959_v2 = vmul.f32 %v954_v14, %v949_v13 }
 0xa44   :  { %v4522_v16 = vadd.f32 %v961_v15, %v959_v2  ;;  %1053 = vrot.lane.b32.xlu1 %v4519_v0, %s4150_s1 }
 0xa46   :  { %1051 = vrot.lane.b32.xlu0 %v4522_v16, %s4150_s1 }
 0xab6   :  { %v1054_v17 = vpop.permute.xlu1 %1053 }
 0xab8   :  { %v1052_v4 = vpop.permute.xlu0 %1051 }
 0xab9   :  { %3672 = vmatprep.mubr.msk.f32.mxu1 %vm84_vm0, %v1052_v4 }
 0xaba   :  { %3673 = vmatmul.mubr.msk.f32.vlgmr.msra.gmra.mxu1 %vm84_vm0, %v1054_v17 }
 0xabb   :  { %3687 = vmatpush3.msra.mxu1 %v4271_v1 }
 0xabc   :  { %3688 = vmatprep.subr.mxu1 %v4283_v3 }
 0xabd   :  { %3689 = vmatpush3.msra.mxu1 %v4283_v3  ;;  %v3663_v3 = vpop.f32.mrf.mxu0 }
 0xabe   :  { %3690 = vmatprep.subr.mxu1 %v4295_v5 }
 0xabf   :  { %3691 = vmatpush3.msra.mxu1 %v4295_v5  ;;  %v1040_v21 = vpop.f32.mrf.mxu0  ;;  %v1046_v5 = vadd.f32 %v3663_v3, %v4359_v18 }
 0xac0   :  { %3692 = vmatprep.subr.mxu1 %v4309_v7  ;;  %v1041_v22 = vadd.f32 %v4359_v18, %v1040_v21  ;;  %v1503_v21 = vld [vmem:[%s5135_s6 + $0x18] sm:$0xff] }
 0xac1   :  { %3693 = vmatpush3.msra.mxu1 %v4309_v7  ;;  %v3685_v60 = vpop.f32.mrf.mxu0 }
 0xac2   :  { %3708 = vmatprep.subr.mxu1 %v4148_v10  ;;  %v1267_v62 = vadd.f32 %v3685_v60, %v4359_v18  ;;  %v4663_v60 = vld [vmem:[%s5138_s9 + $0x10] sm:$0xff] }
 0xac3   :  { %v1261_v61 = vpop.f32.mrf.mxu0 }
 0xac4   :  { %v1262_v63 = vadd.f32 %v4359_v18, %v1261_v61  ;;  %v4672_v61 = vld [vmem:[%s5138_s9 + $0x8] sm:$0xff] }
 0xb7a   :  { %v3674_v6 = vpop.f32.mrf.mxu1 }
 0xb7b   :  { %v1131_v19 = vadd.f32 %v3674_v6, %v4350_v12 }
 0xb7c   :  { %v1125_v20 = vpop.f32.mrf.mxu1 }
 0xb7d   :  { %v1126_v1 = vadd.f32 %v4350_v12, %v1125_v20  ;;  %1152 = vrot.lane.b32.xlu1 %v1131_v19, %s4149_s29  ;;  %v1135_v23 = vadd.f32 %v1131_v19, %v1046_v5 }
 0xb7f   :  { %1150 = vrot.lane.b32.xlu0 %v1126_v1, %s4149_s29  ;;  %v1134_v7 = vadd.f32 %v1126_v1, %v1041_v22  ;;  %v3332_v24 = vmul.f32 -1.442695, %v1135_v23  ;;  %v1413_v23 = vld [vmem:[%s5136_s7 + $0x10] sm:$0xff] }
 0xb81   :  { %v3331_v25 = vmul.f32 -1.442695, %v1134_v7  ;;  %4002 = vpow2.f32 %v3332_v24  ;;  %v1501_v7 = vld [vmem:[%s5135_s6 + $0x8] sm:$0xff] }
 0xb82   :  { %v1412_v24 = vld [vmem:[%s5136_s7 + $0x8] sm:$0xff] }
 0xb83   :  { %4004 = vpow2.f32 %v3331_v25  ;;  %v1500_v25 = vld [vmem:[%s5135_s6] sm:$0xff] }
 0xb8e   :  { %v4003_v26 = vpop.eup %4002 }
 0xb8f   :  { %v1143_v28 = vadd.f32 1.0, %v4003_v26  ;;  %v1718_v26 = vld [vmem:[%s5139_s10 + $0x18] sm:$0xff] }
 0xb90   :  { %v4005_v27 = vpop.eup %4004 }
 0xb91   :  { %v1142_v29 = vadd.f32 1.0, %v4005_v27  ;;  %4006 = vrcp.f32 %v1143_v28 }
 0xb93   :  { %4008 = vrcp.f32 %v1142_v29  ;;  %v1411_v29 = vld [vmem:[%s5136_s7] sm:$0xff] }
 0xb9e   :  { %v4007_v30 = vpop.eup %4006 }
 0xb9f   :  { %v1171_v44 = vsub.f32 1.0, %v4007_v30  ;;  %v1183_v46 = vmul.f32 %v4007_v30, %v4519_v0 }
 0xba0   :  { %v4009_v33 = vpop.eup %4008 }
 0xba1   :  { %v1170_v48 = vsub.f32 1.0, %v4009_v33  ;;  %v1182_v51 = vmul.f32 %v4009_v33, %v4522_v16 }
 0xbef   :  { %v1153_v31 = vpop.permute.xlu1 %1152 }
 0xbf0   :  { %v1157_v32 = vmul.f32 %v4007_v30, %v1153_v31 }
 0xbf1   :  { %v1151_v34 = vpop.permute.xlu0 %1150 }
 0xbf2   :  { %v1156_v35 = vmul.f32 %v4009_v33, %v1151_v34  ;;  %1162 = vrot.lane.b32.xlu1 %v1157_v32, %s4149_s29 }
 0xbf4   :  { %1160 = vrot.lane.b32.xlu0 %v1156_v35, %s4149_s29 }
 0xc64   :  { %v1163_v36 = vpop.permute.xlu1 %1162 }
 0xc65   :  { %v1167_v37 = vadd.f32 %v1163_v36, %v1046_v5  ;;  %v1502_v5 = vld [vmem:[%s5135_s6 + $0x10] sm:$0xff] }
 0xc66   :  { %v1161_v38 = vpop.permute.xlu0 %1160 }
 0xc67   :  { %4010 = vtanh.f32 %v1167_v37  ;;  %v1166_v39 = vadd.f32 %v1161_v38, %v1041_v22  ;;  %v1414_v22 = vld [vmem:[%s5136_s7 + $0x18] sm:$0xff] }
 0xc68   :  { %3697 = vmatprep.subr.mxu0 %v1414_v22 }
 0xc69   :  { %4012 = vtanh.f32 %v1166_v39  ;;  %3698 = vmatpush3.msra.mxu0 %v1414_v22 }
 0xc6a   :  { %3699 = vmatprep.subr.mxu0 %v1413_v23 }
 0xc6b   :  { %3700 = vmatpush3.msra.mxu0 %v1413_v23 }
 0xc6c   :  { %3701 = vmatprep.subr.mxu0 %v1412_v24 }
 0xc6d   :  { %3702 = vmatpush3.msra.mxu0 %v1412_v24 }
 0xc6e   :  { %3703 = vmatprep.subr.mxu0 %v1411_v29 }
 0xc6f   :  { %3704 = vmatpush3.msra.mxu0 %v1411_v29  ;;  %v4745_v29 = vld [vmem:[%s5143_s14 + $0x18] sm:$0xff] }
 0xc74   :  { %v4011_v40 = vpop.eup %4010 }
 0xc75   :  { %1176 = vrot.lane.b32.xlu1 %v4011_v40, %s4150_s1 }
 0xc76   :  { %v4013_v41 = vpop.eup %4012 }
 0xc77   :  { %1174 = vrot.lane.b32.xlu0 %v4013_v41, %s4150_s1  ;;  %v1717_v41 = vld [vmem:[%s5139_s10 + $0x10] sm:$0xff] }
 0xce7   :  { %v1177_v45 = vpop.permute.xlu1 %1176 }
 0xce8   :  { %v1181_v47 = vmul.f32 %v1177_v45, %v1171_v44  ;;  %v1715_v44 = vld [vmem:[%s5139_s10] sm:$0xff]  ;;  %v1507_v45 = vld [vmem:[%s5137_s8 + $0x18] sm:$0xff] }
 0xce9   :  { %v1175_v49 = vpop.permute.xlu0 %1174  ;;  %3719 = vmatprep.subr.mxu0 %v1507_v45 }
 0xcea   :  { %v4557_v50 = vadd.f32 %v1183_v46, %v1181_v47  ;;  %v1180_v52 = vmul.f32 %v1175_v49, %v1170_v48  ;;  %v1506_v46 = vld [vmem:[%s5137_s8 + $0x10] sm:$0xff]  ;;  %v1505_v47 = vld [vmem:[%s5137_s8 + $0x8] sm:$0xff]  ;;  %v1504_v48 = vld [vmem:[%s5137_s8] sm:$0xff] }
 0xcec   :  { %v4560_v53 = vadd.f32 %v1182_v51, %v1180_v52  ;;  %1274 = vrot.lane.b32.xlu1 %v4557_v50, %s4150_s1 }
 0xcee   :  { %1272 = vrot.lane.b32.xlu0 %v4560_v53, %s4150_s1 }
 0xd5e   :  { %v1275_v55 = vpop.permute.xlu1 %1274 }
 0xd60   :  { %v1273_v54 = vpop.permute.xlu0 %1272 }
 0xd61   :  { %3694 = vmatprep.mubr.msk.f32.mxu1 %vm84_vm0, %v1273_v54 }
 0xd62   :  { %3695 = vmatmul.mubr.msk.f32.vlgmr.msra.gmra.mxu1 %vm84_vm0, %v1275_v55 }
 0xd63   :  { %3709 = vmatpush3.msra.mxu1 %v1503_v21  ;;  %3716 = vmatprep.mubr.msk.f32.mxu1 %vm4151_vm1, %v4148_v10 }
 0xd64   :  { %3710 = vmatprep.subr.mxu1 %v4148_v10 }
 0xd65   :  { %3711 = vmatpush3.msra.mxu1 %v1502_v5 }
 0xd66   :  { %3712 = vmatprep.subr.mxu1 %v4148_v10 }
 0xd67   :  { %3713 = vmatpush3.msra.mxu1 %v1501_v7 }
 0xd68   :  { %3714 = vmatprep.subr.mxu1 %v4148_v10 }
 0xd69   :  { %3715 = vmatpush3.msra.mxu1 %v1500_v25 }
 0xd6a   :  { %3730 = vmatprep.subr.mxu1 %v1718_v26 }
 0xe22   :  { %v3696_v56 = vpop.f32.mrf.mxu1 }
 0xe23   :  { %v1352_v57 = vadd.f32 %v3696_v56, %v4350_v12 }
 0xe24   :  { %v1346_v58 = vpop.f32.mrf.mxu1 }
 0xe25   :  { %v1347_v59 = vadd.f32 %v4350_v12, %v1346_v58  ;;  %1373 = vrot.lane.b32.xlu1 %v1352_v57, %s4149_s29  ;;  %v1356_v8 = vadd.f32 %v1352_v57, %v1267_v62  ;;  %v4656_v58 = vld [vmem:[%s5138_s9 + $0x18] sm:$0xff] }
 0xe27   :  { %1371 = vrot.lane.b32.xlu0 %v1347_v59, %s4149_s29  ;;  %v1355_v9 = vadd.f32 %v1347_v59, %v1262_v63  ;;  %v3340_v11 = vmul.f32 -1.442695, %v1356_v8  ;;  %v4697_v8 = vld [vmem:[%s5140_s11 + $0x10] sm:$0xff] }
 0xe29   :  { %v3339_v13 = vmul.f32 -1.442695, %v1355_v9  ;;  %4014 = vpow2.f32 %v3340_v11  ;;  %v4704_v9 = vld [vmem:[%s5140_s11 + $0x8] sm:$0xff]  ;;  %v4711_v11 = vld [vmem:[%s5140_s11] sm:$0xff] }
 0xe2b   :  { %4016 = vpow2.f32 %v3339_v13  ;;  %v4152_v13 = vmov 0  }
 0xe2c   :  { %3952 = vset.pattern.permute.xlu0 %v4152_v13  ;;  %3953 = vset.pattern.permute.xlu1 %v4152_v13 }
 0xe36   :  { %v4015_v14 = vpop.eup %4014 }
 0xe37   :  { %v1364_v15 = vadd.f32 1.0, %v4015_v14  ;;  %v4721_v14 = vld [vmem:[%s5134_s5] sm:$0xff] }
 0xe38   :  { %v4017_v0 = vpop.eup %4016  ;;  %vm1409_vm3 = vcmp.gt.f32.partialorder %v4721_v14, 0.5 }
 0xe39   :  { %v1363_v12 = vadd.f32 1.0, %v4017_v0  ;;  %4018 = vrcp.f32 %v1364_v15  ;;  %v4727_v15 = vld [vmem:[%s5134_s5 + $0x8] sm:$0xf] }
 0xe3a   :  { %vm1410_vm4 = vcmp.gt.f32.partialorder %v4727_v15, 0.5 }
 0xe3b   :  { %4020 = vrcp.f32 %v1363_v12 }
 0xe46   :  { %v4019_v2 = vpop.eup %4018 }
 0xe47   :  { %v1392_v30 = vsub.f32 1.0, %v4019_v2  ;;  %v1404_v32 = vmul.f32 %v4019_v2, %v4557_v50 }
 0xe48   :  { %v4021_v17 = vpop.eup %4020 }
 0xe49   :  { %v1391_v34 = vsub.f32 1.0, %v4021_v17  ;;  %v1403_v37 = vmul.f32 %v4021_v17, %v4560_v53 }
 0xe97   :  { %v1374_v16 = vpop.permute.xlu1 %1373 }
 0xe98   :  { %v1378_v4 = vmul.f32 %v4019_v2, %v1374_v16 }
 0xe99   :  { %v1372_v6 = vpop.permute.xlu0 %1371 }
 0xe9a   :  { %v1377_v19 = vmul.f32 %v4021_v17, %v1372_v6  ;;  %1383 = vrot.lane.b32.xlu1 %v1378_v4, %s4149_s29 }
 0xe9c   :  { %1381 = vrot.lane.b32.xlu0 %v1377_v19, %s4149_s29 }
 0xf0c   :  { %v1384_v18 = vpop.permute.xlu1 %1383 }
 0xf0d   :  { %v1388_v20 = vadd.f32 %v1384_v18, %v1267_v62  ;;  %v4679_v62 = vld [vmem:[%s5138_s9] sm:$0xff] }
 0xf0e   :  { %v1382_v1 = vpop.permute.xlu0 %1381 }
 0xf0f   :  { %4022 = vtanh.f32 %v1388_v20  ;;  %v1387_v3 = vadd.f32 %v1382_v1, %v1262_v63  ;;  %v4692_v63 = vld [vmem:[%s5140_s11 + $0x18] sm:$0xff] }
 0xf11   :  { %4024 = vtanh.f32 %v1387_v3 }
 0xf1c   :  { %v4023_v27 = vpop.eup %4022 }
 0xf1d   :  { %1397 = vrot.lane.b32.xlu1 %v4023_v27, %s4150_s1 }
 0xf1e   :  { %v4025_v28 = vpop.eup %4024 }
 0xf1f   :  { %1395 = vrot.lane.b32.xlu0 %v4025_v28, %s4150_s1 }
 0xf8f   :  { %v1398_v31 = vpop.permute.xlu1 %1397 }
 0xf90   :  { %v1402_v33 = vmul.f32 %v1398_v31, %v1392_v30 }
 0xf91   :  { %v1396_v35 = vpop.permute.xlu0 %1395 }
 0xf92   :  { %v4611_v36 = vadd.f32 %v1404_v32, %v1402_v33  ;;  %v1401_v38 = vmul.f32 %v1396_v35, %v1391_v34  ;;  %v4752_v32 = vld [vmem:[%s5143_s14 + $0x10] sm:$0xff]  ;;  %v4761_v34 = vld [vmem:[%s5143_s14 + $0x8] sm:$0xff] }
 0xf94   :  { %v4614_v39 = vadd.f32 %v1403_v37, %v1401_v38  ;;  %1419 = vrot.lane.b32.xlu1 %v4611_v36, %s4150_s1  ;;  %v4768_v38 = vld [vmem:[%s5143_s14] sm:$0xff]  ;;  %s4153_s14 = smov 112  }
 0xf96   :  { %1417 = vrot.lane.b32.xlu0 %v4614_v39, %s4150_s1 }
0x1006   :  { %v4620_v40 = vpop.permute.xlu1 %1419 }
0x1007   :  { %3717 = vmatmul.mubr.msk.f32.vlgmr.msra.gmra.mxu1 %vm84_vm0, %v4620_v40 }
0x1008   :  { %3731 = vmatpush3.msra.mxu1 %v1718_v26  ;;  %v1418_v42 = vpop.permute.xlu0 %1417 }
0x1009   :  { %3732 = vmatprep.subr.mxu1 %v1717_v41  ;;  %3705 = vmatprep.mubr.msk.f32.mxu0 %vm84_vm0, %v1418_v42 }
0x100a   :  { %3733 = vmatpush3.msra.mxu1 %v1717_v41  ;;  %3738 = vmatprep.mubr.msk.f32.mxu1 %vm84_vm0, %v1418_v42 }
0x100b   :  { %3706 = vmatmul.mubr.msk.f32.vlgmr.msra.gmra.mxu0 %vm84_vm0, %v4620_v40  ;;  %3734 = vmatprep.subr.mxu1 %v1716_v43 }
0x100c   :  { %3735 = vmatpush3.msra.mxu1 %v1716_v43  ;;  %3720 = vmatpush3.msra.mxu0 %v1507_v45 }
0x100d   :  { %3736 = vmatprep.subr.mxu1 %v1715_v44  ;;  %3721 = vmatprep.subr.mxu0 %v1506_v46 }
0x100e   :  { %3737 = vmatpush3.msra.mxu1 %v1715_v44  ;;  %3722 = vmatpush3.msra.mxu0 %v1506_v46 }
0x100f   :  { %3739 = vmatmul.mubr.msk.f32.vlgmr.msra.gmra.mxu1 %vm84_vm0, %v4620_v40  ;;  %3723 = vmatprep.subr.mxu0 %v1505_v47 }
0x1010   :  { %3724 = vmatpush3.msra.mxu0 %v1505_v47  ;;  %3752 = vmatprep.subr.mxu1 %v4692_v63 }
0x1011   :  { %3725 = vmatprep.subr.mxu0 %v1504_v48  ;;  %3753 = vmatpush3.msra.mxu1 %v4692_v63 }
0x1012   :  { %3726 = vmatpush3.msra.mxu0 %v1504_v48  ;;  %3754 = vmatprep.subr.mxu1 %v4697_v8 }
0x1013   :  { %3741 = vmatprep.subr.mxu0 %v4148_v10  ;;  %3755 = vmatpush3.msra.mxu1 %v4697_v8 }
0x1014   :  { %3756 = vmatprep.subr.mxu1 %v4704_v9 }
0x1015   :  { %3757 = vmatpush3.msra.mxu1 %v4704_v9 }
0x1016   :  { %3758 = vmatprep.subr.mxu1 %v4711_v11 }
0x1017   :  { %3759 = vmatpush3.msra.mxu1 %v4711_v11 }
0x1018   :  { %3786 = vmatprep.subr.mxu1 %v4148_v10 }
0x10c7   :  { %v1574_v49 = vpop.f32.mrf.mxu1 }
0x10c8   :  { %v1579_v50 = vrot.slane %v1574_v49, 4 }
0x10c9   :  { %v3718_v51 = vpop.f32.mrf.mxu1 }
0x10ca   :  { %v1582_v55 = vsel %vm1581_vm2, %v1574_v49, %v1579_v50 }
0x10cb   :  { %v3707_v52 = vpop.f32.mrf.mxu0 }
0x10cc   :  { %v1584_v53 = vadd.f32 %v3707_v52, %v1574_v49 }
0x10cd   :  { %v1491_v54 = vpop.f32.mrf.mxu0 }
0x10ce   :  { %v1583_v56 = vadd.f32 %v1582_v55, %v1491_v54 }
0x10cf   :  { %v4732_v17 = vpop.f32.mrf.mxu1 }
0x10d0   :  { %4026 = vtanh.f32 %v1583_v56 }
0x10d1   :  { %4028 = vtanh.f32 %v1584_v53  ;;  %v4736_v21 = vpop.f32.mrf.mxu1 }
0x10dd   :  { %v4027_v57 = vpop.eup %4026 }
0x10de   :  { %v4029_v59 = vpop.eup %4028  ;;  %3727 = vmatprep.mubr.msk.f32.mxu0 %vm84_vm0, %v4027_v57 }
0x10df   :  { %3728 = vmatmul.mubr.msk.f32.vlgmr.msra.gmra.mxu0 %vm84_vm0, %v4029_v59 }
0x10e0   :  { %3742 = vmatpush3.msra.mxu0 %v4656_v58  ;;  %3749 = vmatprep.mubr.msk.f32.mxu0 %vm4151_vm1, %v4148_v10 }
0x10e1   :  { %3743 = vmatprep.subr.mxu0 %v4148_v10 }
0x10e2   :  { %3744 = vmatpush3.msra.mxu0 %v4663_v60 }
0x10e3   :  { %3745 = vmatprep.subr.mxu0 %v4148_v10 }
0x10e4   :  { %3746 = vmatpush3.msra.mxu0 %v4672_v61 }
0x10e5   :  { %3747 = vmatprep.subr.mxu0 %v4148_v10 }
0x10e6   :  { %3748 = vmatpush3.msra.mxu0 %v4679_v62 }
0x10e7   :  { %3750 = vmatmul.mubr.msk.f32.vlgmr.msra.gmra.mxu0 %vm84_vm0, %v4620_v40  ;;  %3763 = vmatprep.subr.mxu0 %v4148_v10 }
0x10e8   :  { %3783 = vmatprep.mubr.msk.f32.mxu0 %vm4151_vm1, %v4148_v10 }
0x119f   :  { %v3729_v0 = vpop.f32.mrf.mxu0 }
0x11a0   :  { %v1669_v6 = vsel %vm1410_vm4, -100000.0, %v3729_v0 }
0x11a1   :  { %v1659_v12 = vpop.f32.mrf.mxu0 }
0x11a2   :  { %v1668_v2 = vsel %vm1409_vm3, -100000.0, %v1659_v12 }
0x11a3   :  { %v1671_v16 = vrot.slane %v1668_v2, 4 }
0x11a5   :  { %v1673_v4 = vmax.f32 %v1668_v2, %v1671_v16 }
0x11a7   :  { %v1674_v19 = vmax.f32 %v1673_v4, %v1669_v6  ;;  %v1889_v18 = vpop.f32.mrf.mxu0 }
0x11a8   :  { %v1894_v20 = vrot.slane %v1889_v18, 4  ;;  %v1898_v7 = vadd.f32 %v4732_v17, %v1889_v18 }
0x11a9   :  { %v1676_v1 = vrot.slane %v1674_v19, 4  ;;  %v3751_v3 = vpop.f32.mrf.mxu0  ;;  %v1680_v25 = vsub.f32 %v1669_v6, %v1674_v19 }
0x11aa   :  { %v1896_v5 = vsel %vm1581_vm2, %v1889_v18, %v1894_v20 }
0x11ab   :  { %v1678_v22 = vsel %vm1581_vm2, %v1674_v19, %v1676_v1  ;;  %v1897_v23 = vadd.f32 %v1896_v5, %v4736_v21  ;;  %v1683_v27 = vmul.f32 1.442695, %v1680_v25  ;;  %v4809_v25 = vld [vmem:[%s5142_s13 + $0x30] sm:$0xff] }
0x11ac   :  { %v1679_v24 = vsub.f32 %v1668_v2, %v1678_v22 }
0x11ad   :  { %4030 = vtanh.f32 %v1897_v23  ;;  %v4790_v23 = vld [vmem:[%s5142_s13 + $0x48] sm:$0xff] }
0x11ae   :  { %v1681_v26 = vmul.f32 1.442695, %v1679_v24  ;;  %4032 = vtanh.f32 %v1898_v7  ;;  %v4795_v7 = vld [vmem:[%s5142_s13 + $0x40] sm:$0xff]  ;;  %3764 = vmatpush3.msra.mxu0 %v4790_v23  ;;  %v4802_v24 = vld [vmem:[%s5142_s13 + $0x38] sm:$0xff] }
0x11af   :  { %3765 = vmatprep.subr.mxu0 %v4148_v10 }
0x11b0   :  { %4034 = vpow2.f32 %v1681_v26  ;;  %3766 = vmatpush3.msra.mxu0 %v4795_v7  ;;  %v4816_v26 = vld [vmem:[%s5142_s13 + $0x28] sm:$0xff] }
0x11b1   :  { %4036 = vpow2.f32 %v1683_v27  ;;  %3767 = vmatprep.subr.mxu0 %v4148_v10  ;;  %v4823_v27 = vld [vmem:[%s5142_s13 + $0x20] sm:$0xff] }
0x11b2   :  { %3768 = vmatpush3.msra.mxu0 %v4802_v24 }
0x11b3   :  { %3769 = vmatprep.subr.mxu0 %v4148_v10 }
0x11b4   :  { %3770 = vmatpush3.msra.mxu0 %v4809_v25 }
0x11b5   :  { %3771 = vmatprep.subr.mxu0 %v4148_v10 }
0x11b6   :  { %3772 = vmatpush3.msra.mxu0 %v4816_v26 }
0x11b7   :  { %3773 = vmatprep.subr.mxu0 %v4148_v10 }
0x11b8   :  { %3774 = vmatpush3.msra.mxu0 %v4823_v27 }
0x11b9   :  { %3775 = vmatprep.subr.mxu0 %v4148_v10 }
0x11ba   :  { %v4031_v28 = vpop.eup %4030 }
0x11bb   :  { %v4033_v30 = vpop.eup %4032  ;;  %3760 = vmatprep.mubr.msk.f32.mxu1 %vm84_vm0, %v4031_v28  ;;  %v4830_v28 = vld [vmem:[%s5142_s13 + $0x18] sm:$0xff] }
0x11bc   :  { %3761 = vmatmul.mubr.msk.f32.vlgmr.msra.gmra.mxu1 %vm84_vm0, %v4033_v30  ;;  %v4837_v30 = vld [vmem:[%s5142_s13 + $0x10] sm:$0xff]  ;;  %3776 = vmatpush3.msra.mxu0 %v4830_v28 }
0x11bd   :  { %v4035_v31 = vpop.eup %4034  ;;  %3787 = vmatpush3.msra.mxu1 %v4745_v29  ;;  %3794 = vmatprep.mubr.msk.f32.mxu1 %vm4151_vm1, %v4148_v10 }
0x11be   :  { %v1686_v33 = vrot.slane %v4035_v31, 4  ;;  %3788 = vmatprep.subr.mxu1 %v4148_v10  ;;  %v4037_v37 = vpop.eup %4036  ;;  %3777 = vmatprep.subr.mxu0 %v4148_v10 }
0x11bf   :  { %3789 = vmatpush3.msra.mxu1 %v4752_v32  ;;  %3778 = vmatpush3.msra.mxu0 %v4837_v30 }
0x11c0   :  { %v1688_v35 = vadd.f32 %v4035_v31, %v1686_v33  ;;  %3790 = vmatprep.subr.mxu1 %v4148_v10  ;;  %3779 = vmatprep.subr.mxu0 %v4148_v10 }
0x11c1   :  { %3791 = vmatpush3.msra.mxu1 %v4761_v34 }
0x11c2   :  { %v1689_v41 = vadd.f32 %v4037_v37, %v1688_v35  ;;  %3792 = vmatprep.subr.mxu1 %v4148_v10 }
0x11c3   :  { %3793 = vmatpush3.msra.mxu1 %v4768_v38 }
0x11c4   :  { %v1691_v42 = vrot.slane %v1689_v41, 4  ;;  %4038 = vrcp.f32 %v1689_v41  ;;  %3795 = vmatmul.mubr.msk.f32.vlgmr.msra.gmra.mxu1 %vm84_vm0, %v4620_v40  ;;  %3797 = vmatprep.subr.mxu1 %v4148_v10 }
0x11c5   :  { %3805 = vmatprep.mubr.msk.f32.mxu1 %vm4151_vm1, %v4148_v10 }
0x11c6   :  { %v1693_v43 = vsel %vm1581_vm2, %v1689_v41, %v1691_v42 }
0x11c7   :  { %4040 = vrcp.f32 %v1693_v43 }
0x11d1   :  { %v4039_v44 = vpop.eup %4038 }
0x11d2   :  { %v1697_v45 = vmul.f32 %v4039_v44, %v4037_v37  ;;  %v4854_v37 = vld [vmem:[%s5142_s13] sm:$0xff] }
0x11d4   :  { %v4041_v46 = vpop.eup %4040 }
0x11d5   :  { %v1695_v47 = vmul.f32 %v4041_v46, %v4035_v31  ;;  %v4844_v31 = vld [vmem:[%s5142_s13 + $0x8] sm:$0xff] }
0x11d6   :  { %3780 = vmatpush3.msra.mxu0 %v4844_v31 }
0x11d7   :  { %1700 = vperm.xlu0 %3952, %v1695_v47   ;;  %3781 = vmatprep.subr.mxu0 %v4148_v10 }
0x11d8   :  { %3782 = vmatpush3.msra.mxu0 %v4854_v37 }
0x11d9   :  { %3819 = vmatprep.subr.mxu0 %v4692_v63 }
0x1252   :  { %v1701_v33 = vpop.permute.xlu0 %1700 }
0x1253   :  { %v1708_v35 = vmul.f32 %v1701_v33, %v4614_v39 }
0x1255   :  { %v1711_v42 = vrot.slane %v1708_v35, 4 }
0x1257   :  { %v1713_v47 = vadd.f32 %v1711_v42, %v1708_v35  ;;  %v4903_v42 = vld [vmem:[%s5146_s17 + $0x18] sm:$0xff] }
0x1258   :  { %3798 = vmatpush3.msra.mxu1 %v4903_v42 }
0x1259   :  { %3799 = vmatprep.subr.mxu1 %v4148_v10 }
0x127c   :  { %v3762_v48 = vpop.f32.mrf.mxu1 }
0x127d   :  { %v1983_v52 = vsel %vm1410_vm4, -100000.0, %v3762_v48 }
0x127e   :  { %v1973_v49 = vpop.f32.mrf.mxu1 }
0x127f   :  { %v1982_v50 = vsel %vm1409_vm3, -100000.0, %v1973_v49 }
0x1280   :  { %v1985_v51 = vrot.slane %v1982_v50, 4 }
0x1282   :  { %v1987_v40 = vmax.f32 %v1982_v50, %v1985_v51 }
0x1284   :  { %v1988_v53 = vmax.f32 %v1987_v40, %v1983_v52  ;;  %v4783_v54 = vpop.f32.mrf.mxu1 }
0x1286   :  { %v1990_v55 = vrot.slane %v1988_v53, 4  ;;  %v3796_v56 = vpop.f32.mrf.mxu1  ;;  %v1994_v13 = vsub.f32 %v1983_v52, %v1988_v53  ;;  %v4864_v52 = vld [vmem:[%s5145_s16] ss:$0 sm:$0xff] }
0x1287   :  { %v3361_v56 = vld [vmem:[%s5141_s12 + $0x4] sm:$0xf] }
0x1288   :  { %v1992_v57 = vsel %vm1581_vm2, %v1988_v53, %v1990_v55  ;;  %v1997_v12 = vmul.f32 1.442695, %v1994_v13  ;;  %v2195_v53 = vadd.f32 %v4864_v52, %v4783_v54  ;;  %v2029_v55 = vld [vmem:[%s5141_s12] sm:$0xf] }
0x1289   :  { %v1993_v59 = vsub.f32 %v1982_v50, %v1992_v57  ;;  %v3369_v57 = vld [vmem:[%s5141_s12 + $0x8] sm:$0xf] }
0x128b   :  { %v1995_v0 = vmul.f32 1.442695, %v1993_v59 }
0x128d   :  { %4042 = vpow2.f32 %v1995_v0 }
0x128e   :  { %4044 = vpow2.f32 %v1997_v12 }
0x129a   :  { %v4043_v2 = vpop.eup %4042 }
0x129b   :  { %v2000_v16 = vrot.slane %v4043_v2, 4  ;;  %v4045_v6 = vpop.eup %4044 }
0x129d   :  { %v2002_v4 = vadd.f32 %v4043_v2, %v2000_v16  ;;  %v4896_v16 = vld [vmem:[%s5144_s15] ss:$0 sm:$0xff] }
0x129f   :  { %v2003_v19 = vadd.f32 %v4045_v6, %v2002_v4 }
0x12a1   :  { %4046 = vrcp.f32 %v2003_v19  ;;  %v2005_v18 = vrot.slane %v2003_v19, 4 }
0x12a3   :  { %v2007_v20 = vsel %vm1581_vm2, %v2003_v19, %v2005_v18 }
0x12a4   :  { %4048 = vrcp.f32 %v2007_v20 }
0x12ae   :  { %v4047_v1 = vpop.eup %4046 }
0x12af   :  { %v2011_v3 = vmul.f32 %v4047_v1, %v4045_v6 }
0x12b1   :  { %v4049_v5 = vpop.eup %4048  ;;  %2019 = vperm.xlu0 %3952, %v2011_v3  }
0x12b2   :  { %v2009_v22 = vmul.f32 %v4049_v5, %v4043_v2 }
0x12b4   :  { %2014 = vperm.xlu1 %3953, %v2009_v22  }
0x12b8   :  { %1705 = vperm.xlu1 %3953, %v1697_v45  }
0x132c   :  { %v2020_v44 = vpop.permute.xlu0 %2019 }
0x132d   :  { %v2023_v48 = vmul.f32 %v2020_v44, %v4611_v36  ;;  %v4915_v44 = vld [vmem:[%s5146_s17 + $0x8] sm:$0xff] }
0x132f   :  { %v2015_v41 = vpop.permute.xlu1 %2014 }
0x1330   :  { %v2022_v43 = vmul.f32 %v2015_v41, %v4614_v39 }
0x1332   :  { %v2025_v45 = vrot.slane %v2022_v43, 4 }
0x1333   :  { %v1706_v46 = vpop.permute.xlu1 %1705 }
0x1334   :  { %v2027_v49 = vadd.f32 %v2025_v45, %v2022_v43  ;;  %v1709_v50 = vmul.f32 %v1706_v46, %v4611_v36  ;;  %v4908_v43 = vld [vmem:[%s5146_s17 + $0x10] sm:$0xff]  ;;  %v4922_v45 = vld [vmem:[%s5146_s17] sm:$0xff] }
0x1335   :  { %3800 = vmatpush3.msra.mxu1 %v4908_v43 }
0x1336   :  { %v1714_v51 = vadd.f32 %v1713_v47, %v1709_v50  ;;  %v2028_v40 = vadd.f32 %v2027_v49, %v2023_v48  ;;  %3801 = vmatprep.subr.mxu1 %v4148_v10 }
0x1337   :  { %3802 = vmatpush3.msra.mxu1 %v4915_v44 }
0x1338   :  { %2031 = vrot.lane.b32.xlu1 %v1714_v51, %s4153_s14  ;;  %2035 = vrot.lane.b32.xlu0 %v2028_v40, %s4154_s3 }
0x1339   :  { %3803 = vmatprep.subr.mxu1 %v4148_v10 }
0x133a   :  { %3804 = vmatpush3.msra.mxu1 %v4922_v45 }
0x133b   :  { %3808 = vmatprep.subr.mxu1 %v4148_v10 }
0x133c   :  { %2206 = vrot.lane.b32.xlu1 %v2195_v53, %s4149_s29 }
0x13aa   :  { %v2032_v59 = vpop.permute.xlu1 %2031  ;;  %v2036_v13 = vpop.permute.xlu0 %2035 }
0x13ab   :  { %v2039_v54 = vsel %vm2038_vm5, %v2029_v55, %v2032_v59  ;;  %v4879_v0 = vsel %vm2038_vm5, %v3361_v56, %v2032_v59  ;;  %v4881_v12 = vsel %vm2038_vm5, %v3369_v57, %v2032_v59 }
0x13ac   :  { %v2041_v2 = vsel %vm2040_vm6, %v2039_v54, %v2036_v13 }
0x13ad   :  { %3784 = vmatmul.mubr.msk.f32.vlgmr.msra.gmra.mxu0 %vm2048_vm7, %v2041_v2 }
0x13ae   :  { %3820 = vmatpush3.msra.mxu0 %v4692_v63  ;;  %v2207_v22 = vpop.permute.xlu1 %2206 }
0x13af   :  { %3821 = vmatprep.subr.mxu0 %v4697_v8 }
0x13b0   :  { %3822 = vmatpush3.msra.mxu0 %v4697_v8 }
0x13b1   :  { %3823 = vmatprep.subr.mxu0 %v4704_v9 }
0x13b2   :  { %3824 = vmatpush3.msra.mxu0 %v4704_v9 }
0x13b3   :  { %3825 = vmatprep.subr.mxu0 %v4711_v11 }
0x13b4   :  { %3826 = vmatpush3.msra.mxu0 %v4711_v11 }
0x13b5   :  { %3853 = vmatprep.subr.mxu0 %v4148_v10 }
0x146d   :  { %v2118_v4 = vpop.f32.mrf.mxu0 }
0x146e   :  { %v2119_v6 = vadd.f32 %v4896_v16, %v2118_v4 }
0x146f   :  { %v3785_v19 = vpop.f32.mrf.mxu0 }
0x1470   :  { %v2198_v18 = vadd.f32 %v2195_v53, %v2119_v6 }
0x1472   :  { %v3355_v20 = vmul.f32 -1.442695, %v2198_v18 }
0x1474   :  { %4050 = vpow2.f32 %v3355_v20 }
0x1481   :  { %v4051_v1 = vpop.eup %4050 }
0x1482   :  { %v2202_v3 = vadd.f32 1.0, %v4051_v1 }
0x1484   :  { %4052 = vrcp.f32 %v2202_v3 }
0x1491   :  { %v4053_v5 = vpop.eup %4052 }
0x1492   :  { %v2209_v33 = vmul.f32 %v4053_v5, %v2207_v22  ;;  %v2216_v47 = vsub.f32 1.0, %v4053_v5  ;;  %v2222_v49 = vmul.f32 %v4053_v5, %v4611_v36 }
0x1494   :  { %2211 = vrot.lane.b32.xlu0 %v2209_v33, %s4149_s29 }
0x1506   :  { %v2212_v35 = vpop.permute.xlu0 %2211 }
0x1507   :  { %v2214_v41 = vadd.f32 %v2212_v35, %v2119_v6 }
0x1509   :  { %4054 = vtanh.f32 %v2214_v41 }
0x1516   :  { %v4055_v46 = vpop.eup %4054 }
0x1517   :  { %2218 = vrot.lane.b32.xlu1 %v4055_v46, %s4150_s1 }
0x1589   :  { %v2219_v48 = vpop.permute.xlu1 %2218 }
0x158a   :  { %v2221_v50 = vmul.f32 %v2219_v48, %v2216_v47 }
0x158c   :  { %v4930_v51 = vadd.f32 %v2222_v49, %v2221_v50 }
0x158e   :  { %2231 = vrot.lane.b32.xlu0 %v4930_v51, %s4150_s1 }
0x1600   :  { %v2232_v40 = vpop.permute.xlu0 %2231 }
0x1601   :  { %3806 = vmatmul.mubr.msk.f32.vlgmr.msra.gmra.mxu1 %vm84_vm0, %v2232_v40 }
0x1602   :  { %3809 = vmatpush3.msra.mxu1 %v4656_v58  ;;  %3816 = vmatprep.mubr.msk.f32.mxu1 %vm4151_vm1, %v4148_v10 }
0x1603   :  { %3810 = vmatprep.subr.mxu1 %v4148_v10 }
0x1604   :  { %3811 = vmatpush3.msra.mxu1 %v4663_v60 }
0x1605   :  { %3812 = vmatprep.subr.mxu1 %v4148_v10 }
0x1606   :  { %3813 = vmatpush3.msra.mxu1 %v4672_v61 }
0x1607   :  { %3814 = vmatprep.subr.mxu1 %v4148_v10 }
0x1608   :  { %3815 = vmatpush3.msra.mxu1 %v4679_v62 }
0x1609   :  { %3817 = vmatmul.mubr.msk.f32.vlgmr.msra.gmra.mxu1 %vm84_vm0, %v2232_v40  ;;  %3830 = vmatprep.subr.mxu1 %v4148_v10 }
0x160a   :  { %3831 = vmatpush3.msra.mxu1 %v4790_v23  ;;  %3850 = vmatprep.mubr.msk.f32.mxu1 %vm4151_vm1, %v4148_v10 }
0x160b   :  { %3832 = vmatprep.subr.mxu1 %v4148_v10 }
0x160c   :  { %3833 = vmatpush3.msra.mxu1 %v4795_v7 }
0x160d   :  { %3834 = vmatprep.subr.mxu1 %v4148_v10 }
0x160e   :  { %3835 = vmatpush3.msra.mxu1 %v4802_v24 }
0x160f   :  { %3836 = vmatprep.subr.mxu1 %v4148_v10 }
0x1610   :  { %3837 = vmatpush3.msra.mxu1 %v4809_v25 }
0x1611   :  { %3838 = vmatprep.subr.mxu1 %v4148_v10 }
0x1612   :  { %3839 = vmatpush3.msra.mxu1 %v4816_v26 }
0x1613   :  { %3840 = vmatprep.subr.mxu1 %v4148_v10 }
0x1614   :  { %3841 = vmatpush3.msra.mxu1 %v4823_v27 }
0x1615   :  { %3842 = vmatprep.subr.mxu1 %v4148_v10 }
0x1616   :  { %3843 = vmatpush3.msra.mxu1 %v4830_v28 }
0x1617   :  { %3844 = vmatprep.subr.mxu1 %v4148_v10 }
0x1618   :  { %3845 = vmatpush3.msra.mxu1 %v4837_v30 }
0x1619   :  { %3846 = vmatprep.subr.mxu1 %v4148_v10 }
0x161a   :  { %3847 = vmatpush3.msra.mxu1 %v4844_v31 }
0x161b   :  { %3848 = vmatprep.subr.mxu1 %v4148_v10 }
0x161c   :  { %3849 = vmatpush3.msra.mxu1 %v4854_v37 }
0x161d   :  { %3886 = vmatprep.subr.mxu1 %v4692_v63 }
0x16c1   :  { %v4968_v53 = vpop.f32.mrf.mxu1 }
0x16c3   :  { %v3807_v55 = vpop.f32.mrf.mxu1 }
0x16c9   :  { %v2385_v56 = vpop.f32.mrf.mxu1 }
0x16ca   :  { %v2390_v57 = vrot.slane %v2385_v56, 4  ;;  %v2394_v54 = vadd.f32 %v4732_v17, %v2385_v56 }
0x16cb   :  { %v3818_v59 = vpop.f32.mrf.mxu1 }
0x16cc   :  { %v2392_v13 = vsel %vm1581_vm2, %v2385_v56, %v2390_v57 }
0x16cd   :  { %v2393_v2 = vadd.f32 %v2392_v13, %v4736_v21 }
0x16cf   :  { %4056 = vtanh.f32 %v2393_v2 }
0x16d0   :  { %4058 = vtanh.f32 %v2394_v54 }
0x16dc   :  { %v4057_v4 = vpop.eup %4056 }
0x16dd   :  { %v4059_v6 = vpop.eup %4058  ;;  %3827 = vmatprep.mubr.msk.f32.mxu0 %vm84_vm0, %v4057_v4 }
0x16de   :  { %3828 = vmatmul.mubr.msk.f32.vlgmr.msra.gmra.mxu0 %vm84_vm0, %v4059_v6 }
0x16df   :  { %3854 = vmatpush3.msra.mxu0 %v4745_v29  ;;  %3861 = vmatprep.mubr.msk.f32.mxu0 %vm4151_vm1, %v4148_v10 }
0x16e0   :  { %3855 = vmatprep.subr.mxu0 %v4148_v10 }
0x16e1   :  { %3856 = vmatpush3.msra.mxu0 %v4752_v32 }
0x16e2   :  { %3857 = vmatprep.subr.mxu0 %v4148_v10 }
0x16e3   :  { %3858 = vmatpush3.msra.mxu0 %v4761_v34 }
0x16e4   :  { %3859 = vmatprep.subr.mxu0 %v4148_v10 }
0x16e5   :  { %3860 = vmatpush3.msra.mxu0 %v4768_v38 }
0x16e6   :  { %3862 = vmatmul.mubr.msk.f32.vlgmr.msra.gmra.mxu0 %vm84_vm0, %v2232_v40  ;;  %3864 = vmatprep.subr.mxu0 %v4148_v10 }
0x16e7   :  { %3865 = vmatpush3.msra.mxu0 %v4903_v42  ;;  %3872 = vmatprep.mubr.msk.f32.mxu0 %vm4151_vm1, %v4148_v10 }
0x16e8   :  { %3866 = vmatprep.subr.mxu0 %v4148_v10 }
0x16e9   :  { %3867 = vmatpush3.msra.mxu0 %v4908_v43 }
0x16ea   :  { %3868 = vmatprep.subr.mxu0 %v4148_v10 }
0x16eb   :  { %3869 = vmatpush3.msra.mxu0 %v4915_v44 }
0x16ec   :  { %3870 = vmatprep.subr.mxu0 %v4148_v10 }
0x16ed   :  { %3871 = vmatpush3.msra.mxu0 %v4922_v45 }
0x16ee   :  { %3875 = vmatprep.subr.mxu0 %v4148_v10 }
0x179e   :  { %v3829_v19 = vpop.f32.mrf.mxu0 }
0x179f   :  { %v2479_v5 = vsel %vm1410_vm4, -100000.0, %v3829_v19 }
0x17a0   :  { %v2469_v18 = vpop.f32.mrf.mxu0 }
0x17a1   :  { %v2478_v20 = vsel %vm1409_vm3, -100000.0, %v2469_v18 }
0x17a2   :  { %v2481_v1 = vrot.slane %v2478_v20, 4 }
0x17a4   :  { %v2483_v3 = vmax.f32 %v2478_v20, %v2481_v1 }
0x17a6   :  { %v2484_v22 = vmax.f32 %v2483_v3, %v2479_v5  ;;  %v2672_v33 = vpop.f32.mrf.mxu0 }
0x17a7   :  { %v2673_v18 = vadd.f32 %v4864_v52, %v2672_v33 }
0x17a8   :  { %v2486_v35 = vrot.slane %v2484_v22, 4  ;;  %v3863_v41 = vpop.f32.mrf.mxu0  ;;  %v2490_v48 = vsub.f32 %v2479_v5, %v2484_v22 }
0x17aa   :  { %v2488_v46 = vsel %vm1581_vm2, %v2484_v22, %v2486_v35  ;;  %v2493_v50 = vmul.f32 1.442695, %v2490_v48 }
0x17ab   :  { %v2489_v47 = vsub.f32 %v2478_v20, %v2488_v46 }
0x17ad   :  { %v2491_v49 = vmul.f32 1.442695, %v2489_v47 }
0x17af   :  { %4060 = vpow2.f32 %v2491_v49 }
0x17b0   :  { %4062 = vpow2.f32 %v2493_v50 }
0x17bc   :  { %v4061_v40 = vpop.eup %4060 }
0x17bd   :  { %v2496_v55 = vrot.slane %v4061_v40, 4  ;;  %v4063_v57 = vpop.eup %4062 }
0x17bf   :  { %v2498_v56 = vadd.f32 %v4061_v40, %v2496_v55 }
0x17c1   :  { %v2499_v59 = vadd.f32 %v4063_v57, %v2498_v56 }
0x17c3   :  { %4064 = vrcp.f32 %v2499_v59  ;;  %v2501_v13 = vrot.slane %v2499_v59, 4 }
0x17c5   :  { %v2503_v54 = vsel %vm1581_vm2, %v2499_v59, %v2501_v13 }
0x17c6   :  { %4066 = vrcp.f32 %v2503_v54 }
0x17d0   :  { %v4065_v2 = vpop.eup %4064 }
0x17d1   :  { %v2507_v4 = vmul.f32 %v4065_v2, %v4063_v57 }
0x17d3   :  { %v4067_v6 = vpop.eup %4066  ;;  %2515 = vperm.xlu0 %3952, %v2507_v4  }
0x17d4   :  { %v2505_v19 = vmul.f32 %v4067_v6, %v4061_v40 }
0x17d6   :  { %2510 = vperm.xlu1 %3953, %v2505_v19  }
0x17d7   :  { %2684 = vrot.lane.b32.xlu0 %v2673_v18, %s4149_s29 }
0x184e   :  { %v2516_v3 = vpop.permute.xlu0 %2515 }
0x184f   :  { %v2519_v22 = vmul.f32 %v2516_v3, %v4611_v36 }
0x1851   :  { %v2511_v20 = vpop.permute.xlu1 %2510 }
0x1852   :  { %v2518_v1 = vmul.f32 %v2511_v20, %v4614_v39  ;;  %v2685_v55 = vpop.permute.xlu0 %2684 }
0x1854   :  { %v2521_v5 = vrot.slane %v2518_v1, 4 }
0x1856   :  { %v2523_v35 = vadd.f32 %v2521_v5, %v2518_v1 }
0x1858   :  { %v2524_v41 = vadd.f32 %v2523_v35, %v2519_v22 }
0x185a   :  { %2528 = vrot.lane.b32.xlu1 %v2524_v41, %s4154_s3 }
0x18cc   :  { %v2529_v46 = vpop.permute.xlu1 %2528 }
0x18cd   :  { %v2532_v47 = vsel %vm2040_vm6, %v4879_v0, %v2529_v46 }
0x18ce   :  { %3851 = vmatmul.mubr.msk.f32.vlgmr.msra.gmra.mxu1 %vm2048_vm7, %v2532_v47 }
0x18cf   :  { %3887 = vmatpush3.msra.mxu1 %v4692_v63 }
0x18d0   :  { %3888 = vmatprep.subr.mxu1 %v4697_v8 }
0x18d1   :  { %3889 = vmatpush3.msra.mxu1 %v4697_v8 }
0x18d2   :  { %3890 = vmatprep.subr.mxu1 %v4704_v9 }
0x18d3   :  { %3891 = vmatpush3.msra.mxu1 %v4704_v9 }
0x18d4   :  { %3892 = vmatprep.subr.mxu1 %v4711_v11 }
0x18d5   :  { %3893 = vmatpush3.msra.mxu1 %v4711_v11 }
0x18d6   :  { %3920 = vmatprep.subr.mxu1 %v4148_v10 }
0x198e   :  { %v2602_v33 = vpop.f32.mrf.mxu1 }
0x198f   :  { %v2603_v0 = vadd.f32 %v4896_v16, %v2602_v33 }
0x1990   :  { %v3852_v48 = vpop.f32.mrf.mxu1 }
0x1991   :  { %v2676_v49 = vadd.f32 %v2673_v18, %v2603_v0 }
0x1993   :  { %v3364_v63 = vmul.f32 -1.442695, %v2676_v49 }
0x1995   :  { %4068 = vpow2.f32 %v3364_v63 }
0x19a2   :  { %v4069_v50 = vpop.eup %4068 }
0x19a3   :  { %v2680_v40 = vadd.f32 1.0, %v4069_v50 }
0x19a5   :  { %4070 = vrcp.f32 %v2680_v40 }
0x19b2   :  { %v4071_v8 = vpop.eup %4070 }
0x19b3   :  { %v2687_v56 = vmul.f32 %v4071_v8, %v2685_v55  ;;  %v2694_v59 = vsub.f32 1.0, %v4071_v8  ;;  %v2700_v54 = vmul.f32 %v4071_v8, %v4930_v51 }
0x19b5   :  { %2689 = vrot.lane.b32.xlu1 %v2687_v56, %s4149_s29 }
0x1a27   :  { %v2690_v9 = vpop.permute.xlu1 %2689 }
0x1a28   :  { %v2692_v57 = vadd.f32 %v2690_v9, %v2603_v0 }
0x1a2a   :  { %4072 = vtanh.f32 %v2692_v57 }
0x1a37   :  { %v4073_v11 = vpop.eup %4072 }
0x1a38   :  { %2696 = vrot.lane.b32.xlu0 %v4073_v11, %s4150_s1 }
0x1aaa   :  { %v2697_v13 = vpop.permute.xlu0 %2696 }
0x1aab   :  { %v2699_v2 = vmul.f32 %v2697_v13, %v2694_v59 }
0x1aad   :  { %v5022_v4 = vadd.f32 %v2700_v54, %v2699_v2 }
0x1aaf   :  { %2703 = vrot.lane.b32.xlu1 %v5022_v4, %s4150_s1 }
0x1b21   :  { %v2704_v6 = vpop.permute.xlu1 %2703 }
0x1b22   :  { %3873 = vmatmul.mubr.msk.f32.vlgmr.msra.gmra.mxu0 %vm84_vm0, %v2704_v6 }
0x1b23   :  { %3876 = vmatpush3.msra.mxu0 %v4656_v58  ;;  %3883 = vmatprep.mubr.msk.f32.mxu0 %vm4151_vm1, %v4148_v10 }
0x1b24   :  { %3877 = vmatprep.subr.mxu0 %v4148_v10 }
0x1b25   :  { %3878 = vmatpush3.msra.mxu0 %v4663_v60 }
0x1b26   :  { %3879 = vmatprep.subr.mxu0 %v4148_v10 }
0x1b27   :  { %3880 = vmatpush3.msra.mxu0 %v4672_v61 }
0x1b28   :  { %3881 = vmatprep.subr.mxu0 %v4148_v10 }
0x1b29   :  { %3882 = vmatpush3.msra.mxu0 %v4679_v62 }
0x1b2a   :  { %3884 = vmatmul.mubr.msk.f32.vlgmr.msra.gmra.mxu0 %vm84_vm0, %v2704_v6  ;;  %3897 = vmatprep.subr.mxu0 %v4148_v10 }
0x1b2b   :  { %3898 = vmatpush3.msra.mxu0 %v4790_v23  ;;  %3917 = vmatprep.mubr.msk.f32.mxu0 %vm4151_vm1, %v4148_v10 }
0x1b2c   :  { %3899 = vmatprep.subr.mxu0 %v4148_v10 }
0x1b2d   :  { %3900 = vmatpush3.msra.mxu0 %v4795_v7 }
0x1b2e   :  { %3901 = vmatprep.subr.mxu0 %v4148_v10 }
0x1b2f   :  { %3902 = vmatpush3.msra.mxu0 %v4802_v24 }
0x1b30   :  { %3903 = vmatprep.subr.mxu0 %v4148_v10 }
0x1b31   :  { %3904 = vmatpush3.msra.mxu0 %v4809_v25 }
0x1b32   :  { %3905 = vmatprep.subr.mxu0 %v4148_v10 }
0x1b33   :  { %3906 = vmatpush3.msra.mxu0 %v4816_v26 }
0x1b34   :  { %3907 = vmatprep.subr.mxu0 %v4148_v10 }
0x1b35   :  { %3908 = vmatpush3.msra.mxu0 %v4823_v27 }
0x1b36   :  { %3909 = vmatprep.subr.mxu0 %v4148_v10 }
0x1b37   :  { %3910 = vmatpush3.msra.mxu0 %v4830_v28 }
0x1b38   :  { %3911 = vmatprep.subr.mxu0 %v4148_v10 }
0x1b39   :  { %3912 = vmatpush3.msra.mxu0 %v4837_v30 }
0x1b3a   :  { %3913 = vmatprep.subr.mxu0 %v4148_v10 }
0x1b3b   :  { %3914 = vmatpush3.msra.mxu0 %v4844_v31 }
0x1b3c   :  { %3915 = vmatprep.subr.mxu0 %v4148_v10 }
0x1b3d   :  { %3916 = vmatpush3.msra.mxu0 %v4854_v37 }
0x1be2   :  { %v5059_v58 = vpop.f32.mrf.mxu0 }
0x1be4   :  { %v3874_v60 = vpop.f32.mrf.mxu0 }
0x1bea   :  { %v2857_v61 = vpop.f32.mrf.mxu0 }
0x1beb   :  { %v2862_v62 = vrot.slane %v2857_v61, 4  ;;  %v2866_v24 = vadd.f32 %v4732_v17, %v2857_v61 }
0x1bec   :  { %v3885_v23 = vpop.f32.mrf.mxu0 }
0x1bed   :  { %v2864_v7 = vsel %vm1581_vm2, %v2857_v61, %v2862_v62 }
0x1bee   :  { %v2865_v25 = vadd.f32 %v2864_v7, %v4736_v21 }
0x1bf0   :  { %4074 = vtanh.f32 %v2865_v25 }
0x1bf1   :  { %4076 = vtanh.f32 %v2866_v24 }
0x1bfd   :  { %v4075_v26 = vpop.eup %4074 }
0x1bfe   :  { %v4077_v27 = vpop.eup %4076  ;;  %3894 = vmatprep.mubr.msk.f32.mxu1 %vm84_vm0, %v4075_v26 }
0x1bff   :  { %3895 = vmatmul.mubr.msk.f32.vlgmr.msra.gmra.mxu1 %vm84_vm0, %v4077_v27 }
0x1c00   :  { %3921 = vmatpush3.msra.mxu1 %v4745_v29  ;;  %3928 = vmatprep.mubr.msk.f32.mxu1 %vm4151_vm1, %v4148_v10 }
0x1c01   :  { %3922 = vmatprep.subr.mxu1 %v4148_v10 }
0x1c02   :  { %3923 = vmatpush3.msra.mxu1 %v4752_v32 }
0x1c03   :  { %3924 = vmatprep.subr.mxu1 %v4148_v10 }
0x1c04   :  { %3925 = vmatpush3.msra.mxu1 %v4761_v34 }
0x1c05   :  { %3926 = vmatprep.subr.mxu1 %v4148_v10 }
0x1c06   :  { %3927 = vmatpush3.msra.mxu1 %v4768_v38 }
0x1c07   :  { %3929 = vmatmul.mubr.msk.f32.vlgmr.msra.gmra.mxu1 %vm84_vm0, %v2704_v6  ;;  %3931 = vmatprep.subr.mxu1 %v4148_v10 }
0x1c08   :  { %3932 = vmatpush3.msra.mxu1 %v4903_v42  ;;  %3939 = vmatprep.mubr.msk.f32.mxu1 %vm4151_vm1, %v4148_v10 }
0x1c09   :  { %3933 = vmatprep.subr.mxu1 %v4148_v10 }
0x1c0a   :  { %3934 = vmatpush3.msra.mxu1 %v4908_v43 }
0x1c0b   :  { %3935 = vmatprep.subr.mxu1 %v4148_v10 }
0x1c0c   :  { %3936 = vmatpush3.msra.mxu1 %v4915_v44 }
0x1c0d   :  { %3937 = vmatprep.subr.mxu1 %v4148_v10 }
0x1c0e   :  { %3938 = vmatpush3.msra.mxu1 %v4922_v45 }
0x1cbf   :  { %v3896_v17 = vpop.f32.mrf.mxu1 }
0x1cc0   :  { %v2951_v38 = vsel %vm1410_vm4, -100000.0, %v3896_v17 }
0x1cc1   :  { %v2941_v21 = vpop.f32.mrf.mxu1 }
0x1cc2   :  { %v2950_v29 = vsel %vm1409_vm3, -100000.0, %v2941_v21 }
0x1cc3   :  { %v2953_v32 = vrot.slane %v2950_v29, 4 }
0x1cc5   :  { %v2955_v34 = vmax.f32 %v2950_v29, %v2953_v32 }
0x1cc7   :  { %v2956_v28 = vmax.f32 %v2955_v34, %v2951_v38  ;;  %v3144_v30 = vpop.f32.mrf.mxu1 }
0x1cc8   :  { %v3145_v41 = vadd.f32 %v4864_v52, %v3144_v30 }
0x1cc9   :  { %v2958_v31 = vrot.slane %v2956_v28, 4  ;;  %v3930_v37 = vpop.f32.mrf.mxu1  ;;  %v2962_v10 = vsub.f32 %v2951_v38, %v2956_v28 }
0x1ccb   :  { %v2960_v42 = vsel %vm1581_vm2, %v2956_v28, %v2958_v31  ;;  %v2965_v45 = vmul.f32 1.442695, %v2962_v10 }
0x1ccc   :  { %v2961_v43 = vsub.f32 %v2950_v29, %v2960_v42 }
0x1cce   :  { %v2963_v44 = vmul.f32 1.442695, %v2961_v43 }
0x1cd0   :  { %4078 = vpow2.f32 %v2963_v44 }
0x1cd1   :  { %4080 = vpow2.f32 %v2965_v45 }
0x1cdd   :  { %v4079_v51 = vpop.eup %4078 }
0x1cde   :  { %v2968_v14 = vrot.slane %v4079_v51, 4  ;;  %v4081_v18 = vpop.eup %4080 }
0x1ce0   :  { %v2970_v19 = vadd.f32 %v4079_v51, %v2968_v14 }
0x1ce2   :  { %v2971_v20 = vadd.f32 %v4081_v18, %v2970_v19 }
0x1ce4   :  { %4082 = vrcp.f32 %v2971_v20  ;;  %v2973_v15 = vrot.slane %v2971_v20, 4 }
0x1ce6   :  { %v2975_v1 = vsel %vm1581_vm2, %v2971_v20, %v2973_v15 }
0x1ce7   :  { %4084 = vrcp.f32 %v2975_v1 }
0x1cf1   :  { %v4083_v3 = vpop.eup %4082 }
0x1cf2   :  { %v2979_v5 = vmul.f32 %v4083_v3, %v4081_v18 }
0x1cf4   :  { %v4085_v22 = vpop.eup %4084  ;;  %2987 = vperm.xlu1 %3953, %v2979_v5  }
0x1cf5   :  { %v2977_v35 = vmul.f32 %v4085_v22, %v4079_v51 }
0x1cf7   :  { %2982 = vperm.xlu0 %3952, %v2977_v35  }
0x1cf8   :  { %3156 = vrot.lane.b32.xlu1 %v3145_v41, %s4149_s29 }
0x1d6f   :  { %v2988_v33 = vpop.permute.xlu1 %2987 }
0x1d70   :  { %v2991_v48 = vmul.f32 %v2988_v33, %v4611_v36 }
0x1d72   :  { %v2983_v46 = vpop.permute.xlu0 %2982 }
0x1d73   :  { %v2990_v47 = vmul.f32 %v2983_v46, %v4614_v39  ;;  %v3157_v11 = vpop.permute.xlu1 %3156 }
0x1d75   :  { %v2993_v0 = vrot.slane %v2990_v47, 4 }
0x1d77   :  { %v2995_v49 = vadd.f32 %v2993_v0, %v2990_v47 }
0x1d79   :  { %v2996_v63 = vadd.f32 %v2995_v49, %v2991_v48 }
0x1d7b   :  { %3000 = vrot.lane.b32.xlu0 %v2996_v63, %s4154_s3 }
0x1ded   :  { %v3001_v50 = vpop.permute.xlu0 %3000 }
0x1dee   :  { %v3004_v40 = vsel %vm2040_vm6, %v4881_v12, %v3001_v50 }
0x1def   :  { %3918 = vmatmul.mubr.msk.f32.vlgmr.msra.gmra.mxu0 %vm2048_vm7, %v3004_v40 }
0x1eaf   :  { %v3074_v52 = vpop.f32.mrf.mxu0 }
0x1eb0   :  { %v3075_v8 = vadd.f32 %v4896_v16, %v3074_v52  ;;  %v3356_v16 = vld [vmem:[%s5147_s18] ss:$0 sm:$0xff]  ;;  %s4155_s18 = smov [#allocation4]  }
0x1eb1   :  { %v3919_v55 = vpop.f32.mrf.mxu0  ;;  %v2302_v2 = vadd.f32 %v3356_v16, %v4968_v53  ;;  %v2774_v24 = vadd.f32 %v3356_v16, %v5059_v58 }
0x1eb2   :  { %v3148_v56 = vadd.f32 %v3145_v41, %v3075_v8 }
0x1eb3   :  { %v2306_v6 = vsel %vm2305_vm8, %v2302_v2, -inf  ;;  %v2777_v25 = vsel %vm2305_vm8, %v2774_v24, -inf }
0x1eb4   :  { %v3372_v39 = vmul.f32 -1.442695, %v3148_v56 }
0x1eb6   :  { %4086 = vpow2.f32 %v3372_v39 }
0x1ec3   :  { %v4087_v9 = vpop.eup %4086 }
0x1ec4   :  { %v3152_v57 = vadd.f32 1.0, %v4087_v9 }
0x1ec6   :  { %4088 = vrcp.f32 %v3152_v57 }
0x1ed3   :  { %v4089_v36 = vpop.eup %4088 }
0x1ed4   :  { %v3159_v59 = vmul.f32 %v4089_v36, %v3157_v11  ;;  %v3166_v60 = vsub.f32 1.0, %v4089_v36  ;;  %v3172_v62 = vmul.f32 %v4089_v36, %v5022_v4 }
0x1ed6   :  { %3161 = vrot.lane.b32.xlu0 %v3159_v59, %s4149_s29 }
0x1f48   :  { %v3162_v13 = vpop.permute.xlu0 %3161 }
0x1f49   :  { %v3164_v54 = vadd.f32 %v3162_v13, %v3075_v8 }
0x1f4b   :  { %4090 = vtanh.f32 %v3164_v54 }
0x1f58   :  { %v4091_v12 = vpop.eup %4090 }
0x1f59   :  { %3168 = vrot.lane.b32.xlu1 %v4091_v12, %s4150_s1 }
0x1f7d   :  { %2307 = vmax.xlane.f32.xlu1 %v2306_v6 }
0x1fcb   :  { %v3169_v61 = vpop.permute.xlu1 %3168 }
0x1fcc   :  { %v3171_v23 = vmul.f32 %v3169_v61, %v3166_v60 }
0x1fce   :  { %v3173_v7 = vadd.f32 %v3172_v62, %v3171_v23 }
0x1fd0   :  { %3175 = vrot.lane.b32.xlu0 %v3173_v7, %s4150_s1  ;;  %s3283_s1 = sshll.u32 %s4155_s18, 4  ;;  %s3284_s1 = int_to_ptr.vmem [resolvable:$true] %s3283_s1 }
0x1fd1   :  { %s4104_s7 = scalar_lea.vmem %s3284_s1, 64  ;;  %p4109_p1 = scmp.lt.s32.totalorder %s3284_s1, %s3284_s1 }
0x1fd2   :  { %p4105_p0 = scmp.ne.s32.totalorder %s3284_s1, %s4104_s7  ;;  %p4110_p2 = scmp.lt.s32.totalorder %s4104_s7, %s4104_s7 }
0x1fd4   :  { %p4111_p3 = por %p4110_p2, %p4109_p1 }
0x1fd6   :  { %p4112_p4 = pnand %p4111_p3, %p4105_p0 }
0x1fef   :  { %2778 = vmax.xlane.f32.xlu0 %v2777_v25 }
0x2006   :  { %v2308_v26 = vpop.xlane.xlu1 %2307 }
0x2007   :  { %v2309_v27 = vsub.f32 %v2302_v2, %v2308_v26 }
0x2009   :  { %v2310_v53 = vmul.f32 1.442695, %v2309_v27 }
0x200b   :  { %4092 = vpow2.f32 %v2310_v53 }
0x2018   :  { %v4093_v17 = vpop.eup %4092 }
0x2019   :  { %v2312_v21 = vsel %vm2305_vm8, %v4093_v17, 0.0 }
0x201a   :  { %2313 = vadd.xlane.f32.xlu1 %v2312_v21 }
0x2042   :  { %v3176_v29 = vpop.permute.xlu0 %3175 }
0x2043   :  { %3264 = vst.msk [vmem:[#allocation4] sm:$0xf] %vm2305_vm8, %v3176_v29  ;;  %3940 = vmatmul.mubr.msk.f32.vlgmr.msra.gmra.mxu1 %vm84_vm0, %v3176_v29 }
0x2078   :  { %v2779_v38 = vpop.xlane.xlu0 %2778 }
0x2079   :  { %v2780_v28 = vsub.f32 %v2774_v24, %v2779_v38 }
0x207b   :  { %v2781_v30 = vmul.f32 1.442695, %v2780_v28 }
0x20a3   :  { %v2314_v4 = vpop.xlane.xlu1 %2313 }
0x20a4   :  { %4094 = vlog2.f32 %v2314_v4 }
0x20a5   :  { %4096 = vpow2.f32 %v2781_v30 }
0x20b1   :  { %v4095_v32 = vpop.eup %4094 }
0x20b2   :  { %v2316_v58 = vmul.f32 0.6931472, %v4095_v32  ;;  %v4097_v10 = vpop.eup %4096 }
0x20b3   :  { %v2783_v44 = vsel %vm2305_vm8, %v4097_v10, 0.0 }
0x20b4   :  { %v2317_v34 = vsub.f32 %v2309_v27, %v2316_v58 }
0x20b6   :  { %2318 = vst.msk [vmem:[#allocation2] sm:$0xf] %vm2305_vm8, %v2317_v34 }
0x2103   :  { %v3245_v31 = vpop.f32.mrf.mxu1 }
0x2104   :  { %v3246_v37 = vadd.f32 %v3356_v16, %v3245_v31 }
0x2105   :  { %v3941_v42 = vpop.f32.mrf.mxu1 }
0x2106   :  { %v3249_v43 = vsel %vm2305_vm8, %v3246_v37, -inf }
0x2107   :  { %3250 = vmax.xlane.f32.xlu0 %v3249_v43 }
0x210b   :  { %2784 = vadd.xlane.f32.xlu0 %v2783_v44 }
0x2190   :  { %v3251_v45 = vpop.xlane.xlu0 %3250 }
0x2191   :  { %v3252_v51 = vsub.f32 %v3246_v37, %v3251_v45 }
0x2193   :  { %v3253_v14 = vmul.f32 1.442695, %v3252_v51 }
0x2194   :  { %v2785_v19 = vpop.xlane.xlu0 %2784 }
0x2195   :  { %4098 = vpow2.f32 %v3253_v14 }
0x2196   :  { %4100 = vlog2.f32 %v2785_v19 }
0x21a2   :  { %v4099_v18 = vpop.eup %4098 }
0x21a3   :  { %v4101_v20 = vpop.eup %4100  ;;  %v3255_v15 = vsel %vm2305_vm8, %v4099_v18, 0.0 }
0x21a4   :  { %v2787_v1 = vmul.f32 0.6931472, %v4101_v20  ;;  %3256 = vadd.xlane.f32.xlu1 %v3255_v15 }
0x21a6   :  { %v2788_v3 = vsub.f32 %v2780_v28, %v2787_v1 }
0x21a8   :  { %2790 = vst.msk [vmem:[#allocation2 + $0x4] sm:$0xf] %vm2305_vm8, %v2788_v3 }
0x21a9   :  { %4115 = shalt.err (!%p4112_p4)
}
0x21aa   :  { %3286 = dma.vmem_to_hbm [thread:$0]  %s3284_s1, 64, %s5149_s20, [#allocation5]  }
0x21ab   :  { %s4156_s24 = smov [#allocation2]  }
0x21ac   :  { %s3270_s13 = sshll.u32 %s4156_s24, 4  ;;  %s3271_s13 = int_to_ptr.vmem [resolvable:$true] %s3270_s13 }
0x21ad   :  { %s4124_s2 = scalar_lea.vmem %s3271_s13, 192  ;;  %p4129_p6 = scmp.lt.s32.totalorder %s3271_s13, %s3271_s13 }
0x21ae   :  { %p4125_p5 = scmp.ne.s32.totalorder %s3271_s13, %s4124_s2  ;;  %p4130_p7 = scmp.lt.s32.totalorder %s4124_s2, %s4124_s2 }
0x21b0   :  { %p4131_p8 = por %p4130_p7, %p4129_p6 }
0x21b2   :  { %p4132_p9 = pnand %p4131_p8, %p4125_p5 }
0x222d   :  { %v3257_v5 = vpop.xlane.xlu1 %3256 }
0x222e   :  { %4102 = vlog2.f32 %v3257_v5 }
0x223b   :  { %v4103_v22 = vpop.eup %4102 }
0x223c   :  { %v3259_v35 = vmul.f32 0.6931472, %v4103_v22 }
0x223e   :  { %v3260_v41 = vsub.f32 %v3252_v51, %v3259_v35 }
0x2240   :  { %3262 = vst.msk [vmem:[#allocation2 + $0x8] sm:$0xf] %vm2305_vm8, %v3260_v41 }
0x2241   :  { %4135 = shalt.err (!%p4132_p9)
}
0x2242   :  { %s4157_s14 = smov 4  }
0x2243   :  { %3276 = dma.vmem_to_hbm [thread:$0]  %s3271_s13, 192, %s5148_s19, [#allocation3], %s4149_s29, %s4149_s29, %s4157_s14  }
0x2244   :  { %4144 = dma.done.wait [#allocation3], 192  }
0x2245   :  { %4145 = vsyncadd [#allocation3], 4294967104 }
0x2246   :  { %4146 = dma.done.wait [#allocation5], 64  }
0x2247   :  { %4147 = vsyncadd [#allocation5], 4294967232 }
0x2248   :  { %3293 = vsyncpa [#allocation3], 1 }
0x2249   :  { %3294 = vsyncpa [#allocation5], 1 }

</bundles_post_ra>
